<compile_context>
chip_gen: v7x
topology: tpu7x:2x2x1
jax: 0.10.0
libtpu: 0.0.40
codegen_flags: <defaults>
</compile_context>

<pallas_src>
import functools

import jax
import jax.numpy as jnp
from jax.experimental import pallas as pl
from jax.experimental.pallas import tpu as pltpu


def _fx_kernel(z1_ref, w1_ref, b1_ref, w2_ref, b2_ref, w3_ref, b3_ref, o_ref,
               *, ho, wo, neg_slope):
    """One batch element: conv1(s2)+lrelu -> conv2+lrelu -> conv3+lrelu.

    z1_ref : (ho+1, wo+1, 4*c_in) bf16   space-to-depth'd zero-padded input
    w1_ref : (2, 2*4*c_in, c_out) bf16   conv1 weights, kw-folded 2x2-tap form
    w2_ref : (3, 3*c_out, c_out)  bf16   conv2 weights, (di, (dj,cin), cout)
    w3_ref : (3, 3*c_out, c_out)  bf16
    b*_ref : (1, c_out) f32
    o_ref  : (ho, wo*c_out)              lane-dense output slab
    """
    c_out = w2_ref.shape[-1]

    def conv_lrelu(src, w_ref, b_ref, kh, kw):
        # src: (kh-1+ho, kw-1+wo, cin) bf16 -> (ho*wo, cout) f32 post-LeakyReLU.
        cin = src.shape[-1]
        # Fold the kw taps onto the contraction axis: kh matmuls with K=kw*cin
        # instead of kh*kw matmuls with K=cin.
        cols = jnp.concatenate([src[:, dj:dj + wo, :] for dj in range(kw)],
                               axis=-1)                    # (kh-1+ho, wo, kw*cin)
        acc = None
        for di in range(kh):
            # wo is a multiple of 8 at the test shapes, so this merge is free.
            tap = cols[di:di + ho].reshape(ho * wo, kw * cin)
            part = jnp.dot(tap, w_ref[di], preferred_element_type=jnp.float32)
            acc = part if acc is None else acc + part
        acc = acc + b_ref[...].astype(jnp.float32)
        return jnp.where(acc > 0, acc, neg_slope * acc)    # LeakyReLU(0.1)

    def pad_hw(acc):
        # (ho*wo, c_out) f32 -> (ho+2, wo+2, c_out) bf16 with a zero border.
        h3 = acc.reshape(ho, wo, c_out).astype(jnp.bfloat16)
        zc = jnp.zeros((ho, 1, c_out), jnp.bfloat16)
        rows = jnp.concatenate([zc, h3, zc], axis=1)        # (ho, wo+2, c_out)
        zr = jnp.zeros((1, wo + 2, c_out), jnp.bfloat16)
        return jnp.concatenate([zr, rows, zr], axis=0)      # (ho+2, wo+2, c_out)

    # conv1: stride-2 conv rewritten (wrapper-side) as a dense 2x2-tap conv on
    # the space-to-depth input; bf16 MXU inputs, f32 accumulation.
    h = conv_lrelu(z1_ref[...], w1_ref, b1_ref, 2, 2)
    # conv2 / conv3: padding fused on-chip, intermediates stay bf16 in VMEM.
    h = conv_lrelu(pad_hw(h), w2_ref, b2_ref, 3, 3)
    h = conv_lrelu(pad_hw(h), w3_ref, b3_ref, 3, 3)

    # Lane-dense store: flatten (wo, c_out) onto the lane axis so the final
    # store is full-width vst's instead of c_out(=32)-wide masked ones.
    h3 = h.reshape(ho, wo, c_out)
    dense = jnp.concatenate([h3[:, j, :] for j in range(wo)], axis=-1)
    o_ref[...] = dense.astype(o_ref.dtype)


def _vmem_padded_bytes(shape, dtype):
    """Bytes a VMEM tile of `shape` occupies, incl. lane/sublane padding."""
    itemsize = jnp.dtype(dtype).itemsize
    sublane = max(8, 32 // itemsize)        # 8 (f32), 16 (bf16), 32 (int8)
    dims = list(shape)
    dims[-1] = -(-dims[-1] // 128) * 128
    if len(dims) >= 2:
        dims[-2] = -(-dims[-2] // sublane) * sublane
    total = itemsize
    for d in dims:
        total *= d
    return total


def feature_extractor(x, params):
    """Pallas forward of FeatureExtractor. x: (N, C_in, H, W) NCHW, like PyTorch."""
    w1, b1, w2, b2, w3, b3 = params
    n, c_in, h, w = x.shape
    c_out = w1.shape[0]
    assert w1.shape == (c_out, c_in, 3, 3)
    assert w2.shape == (c_out, c_out, 3, 3) and w3.shape == (c_out, c_out, 3, 3)
    assert h % 2 == 0 and w % 2 == 0, "even spatial dims expected"
    ho, wo = h // 2, w // 2
    hp1, wp1 = ho + 1, wo + 1

    # ---- wrapper-side layout plumbing (cheap, no compute hoisted) ----------
    # NCHW -> NHWC, zero-pad by 1, space-to-depth so the stride-2 conv becomes
    # a dense 2x2-tap stride-1 conv.  Activations/weights cast to bf16 so the
    # MXU runs native bf16 with f32 accumulation (and input DMA is halved).
    xh = jnp.transpose(x, (0, 2, 3, 1))                          # (N, H, W, Cin)
    xp = jnp.pad(xh, ((0, 0), (1, 1), (1, 1), (0, 0)))           # (N, H+2, W+2, Cin)
    z1 = xp.reshape(n, hp1, 2, wp1, 2, c_in)
    z1 = jnp.transpose(z1, (0, 1, 3, 2, 4, 5)).reshape(n, hp1, wp1, 4 * c_in)
    z1 = z1.astype(jnp.bfloat16)

    # conv1 weights (Cout, Cin, 3, 3) -> kw-folded 2-tap form (2, 8*Cin, Cout).
    w1p = jnp.pad(w1, ((0, 0), (0, 0), (0, 1), (0, 1)))          # (Cout, Cin, 4, 4)
    w1r = w1p.reshape(c_out, c_in, 2, 2, 2, 2)                   # [o, c, qi, a, qj, b]
    w1f = jnp.transpose(w1r, (2, 4, 3, 5, 1, 0)).reshape(2, 8 * c_in, c_out)
    w1f = w1f.astype(jnp.bfloat16)
    # conv2/3 weights -> kw-folded (3, 3*Cout, Cout); biases -> (1, Cout) f32.
    w2f = jnp.transpose(w2, (2, 3, 1, 0)).reshape(3, 3 * c_out, c_out).astype(jnp.bfloat16)
    w3f = jnp.transpose(w3, (2, 3, 1, 0)).reshape(3, 3 * c_out, c_out).astype(jnp.bfloat16)
    b1r = b1.reshape(1, c_out).astype(jnp.float32)
    b2r = b2.reshape(1, c_out).astype(jnp.float32)
    b3r = b3.reshape(1, c_out).astype(jnp.float32)

    kernel = functools.partial(_fx_kernel, ho=ho, wo=wo, neg_slope=0.1)

    # VMEM sizing with minor-dim padding taken into account.
    vmem_need = (
        2 * _vmem_padded_bytes((hp1, wp1, 4 * c_in), jnp.bfloat16)       # z1 block (dbl-buffered)
        + 2 * _vmem_padded_bytes((ho, wo * c_out), x.dtype)              # output block (dbl-buffered)
        + 2 * (_vmem_padded_bytes((2, 8 * c_in, c_out), jnp.bfloat16)
               + 2 * _vmem_padded_bytes((3, 3 * c_out, c_out), jnp.bfloat16)
               + 3 * _vmem_padded_bytes((1, c_out), jnp.float32))        # weights / biases
        + 4 * _vmem_padded_bytes((ho + 2, wo + 2, c_out), jnp.bfloat16)  # padded intermediates
        + 4 * _vmem_padded_bytes((ho + 2, wo, 3 * c_out), jnp.bfloat16)  # folded tap slabs
        + 4 * _vmem_padded_bytes((ho * wo, c_out), jnp.float32)          # f32 accumulators
    )
    vmem_limit = int(min(max(2 * vmem_need, 32 * 1024 * 1024), 100 * 1024 * 1024))

    flops = 2 * n * ho * wo * c_out * (16 * c_in + 9 * c_out + 9 * c_out)
    bytes_accessed = (z1.size * 2
                      + (w1f.size + w2f.size + w3f.size) * 2
                      + (b1r.size + b2r.size + b3r.size) * 4
                      + n * ho * wo * c_out * jnp.dtype(x.dtype).itemsize)

    out_flat = pl.pallas_call(
        kernel,
        out_shape=jax.ShapeDtypeStruct((n, ho, wo * c_out), x.dtype),
        grid_spec=pltpu.PrefetchScalarGridSpec(
            num_scalar_prefetch=0,
            grid=(n,),
            in_specs=[
                pl.BlockSpec((pl.Squeezed(), hp1, wp1, 4 * c_in),
                             lambda b: (b, 0, 0, 0)),
                pl.BlockSpec((2, 8 * c_in, c_out), lambda b: (0, 0, 0)),
                pl.BlockSpec((1, c_out), lambda b: (0, 0)),
                pl.BlockSpec((3, 3 * c_out, c_out), lambda b: (0, 0, 0)),
                pl.BlockSpec((1, c_out), lambda b: (0, 0)),
                pl.BlockSpec((3, 3 * c_out, c_out), lambda b: (0, 0, 0)),
                pl.BlockSpec((1, c_out), lambda b: (0, 0)),
            ],
            out_specs=pl.BlockSpec((pl.Squeezed(), ho, wo * c_out),
                                   lambda b: (b, 0, 0)),
        ),
        compiler_params=pltpu.CompilerParams(
            dimension_semantics=("parallel",),
            vmem_limit_bytes=vmem_limit,
        ),
        cost_estimate=pl.CostEstimate(flops=int(flops), transcendentals=0,
                                      bytes_accessed=int(bytes_accessed)),
    )(z1, w1f, b1r, w2f, b2r, w3f, b3r)

    out = out_flat.reshape(n, ho, wo, c_out)                      # NHWC
    return jnp.transpose(out, (0, 3, 1, 2))                       # back to NCHW


def _feature_extractor_ref(x, params):
    """Pure-JAX reference mirroring the PyTorch module, for verification."""
    w1, b1, w2, b2, w3, b3 = params

    def conv(x, w, b, stride):
        y = jax.lax.conv_general_dilated(
            x, w, (stride, stride), ((1, 1), (1, 1)),
            dimension_numbers=("NCHW", "OIHW", "NCHW"),
            precision=jax.lax.Precision.HIGHEST)
        return y + b[None, :, None, None]

    def lrelu(v):
        return jnp.where(v > 0, v, 0.1 * v)

    x = lrelu(conv(x, w1, b1, 2))
    x = lrelu(conv(x, w2, b2, 1))
    x = lrelu(conv(x, w3, b3, 1))
    return x


if __name__ == "__main__":
    key = jax.random.PRNGKey(0)
    ks = jax.random.split(key, 7)

    n, c_in, c_out, h, w = 2, 4, 32, 16, 16

    x = jax.random.normal(ks[0], (n, c_in, h, w), jnp.float32)
    w1 = 0.15 * jax.random.normal(ks[1], (c_out, c_in, 3, 3), jnp.float32)
    b1 = 0.05 * jax.random.normal(ks[2], (c_out,), jnp.float32)
    w2 = 0.06 * jax.random.normal(ks[3], (c_out, c_out, 3, 3), jnp.float32)
    b2 = 0.05 * jax.random.normal(ks[4], (c_out,), jnp.float32)
    w3 = 0.06 * jax.random.normal(ks[5], (c_out, c_out, 3, 3), jnp.float32)
    b3 = 0.05 * jax.random.normal(ks[6], (c_out,), jnp.float32)
    params = (w1, b1, w2, b2, w3, b3)

    out = feature_extractor(x, params)
    out = jax.block_until_ready(out)

    ref = _feature_extractor_ref(x, params)
    assert out.shape == (n, c_out, h // 2, w // 2), out.shape
    # bf16 MXU inputs + bf16 intermediates vs. an f32/HIGHEST reference:
    # tolerance relaxed accordingly (real bugs produce O(1) errors).
    max_err = float(jnp.max(jnp.abs(out - ref)))
    assert jnp.allclose(out, ref, atol=5e-2, rtol=5e-2), max_err

    print("KERNEL_OK")
</pallas_src>

<mosaic_0001>
module attributes {stable_mosaic.version = 11 : i64} {
  func.func @_fx_kernel(%arg0: i32, %arg1: memref<1x9x9x16xbf16, #tpu.memory_space<vmem>>, %arg2: memref<2x32x32xbf16, #tpu.memory_space<vmem>>, %arg3: memref<1x32xf32, #tpu.memory_space<vmem>>, %arg4: memref<3x96x32xbf16, #tpu.memory_space<vmem>>, %arg5: memref<1x32xf32, #tpu.memory_space<vmem>>, %arg6: memref<3x96x32xbf16, #tpu.memory_space<vmem>>, %arg7: memref<1x32xf32, #tpu.memory_space<vmem>>, %arg8: memref<1x8x256xf32, #tpu.memory_space<vmem>>) attributes {dimension_semantics = [#tpu.dimension_semantics<parallel>], iteration_bounds = array<i64: 2>, scalar_prefetch = 0 : i64, scratch_operands = 0 : i64, tpu.core_type = #tpu.core_type<tc>, window_params = [{transform_indices = @transform_0, window_bounds = array<i64: 1, 9, 9, 16>}, {pipeline_mode = #tpu.pipeline_mode<synchronous>, transform_indices = @transform_1, window_bounds = array<i64: 2, 32, 32>}, {pipeline_mode = #tpu.pipeline_mode<synchronous>, transform_indices = @transform_2, window_bounds = array<i64: 1, 32>}, {pipeline_mode = #tpu.pipeline_mode<synchronous>, transform_indices = @transform_3, window_bounds = array<i64: 3, 96, 32>}, {pipeline_mode = #tpu.pipeline_mode<synchronous>, transform_indices = @transform_4, window_bounds = array<i64: 1, 32>}, {pipeline_mode = #tpu.pipeline_mode<synchronous>, transform_indices = @transform_5, window_bounds = array<i64: 3, 96, 32>}, {pipeline_mode = #tpu.pipeline_mode<synchronous>, transform_indices = @transform_6, window_bounds = array<i64: 1, 32>}, {transform_indices = @transform_7, window_bounds = array<i64: 1, 8, 256>}]} {
    %c0 = arith.constant 0 : index
    %c0_0 = arith.constant 0 : index
    %c0_1 = arith.constant 0 : index
    %c0_2 = arith.constant 0 : index
    %0 = vector.load %arg1[%c0, %c0_0, %c0_1, %c0_2] : memref<1x9x9x16xbf16, #tpu.memory_space<vmem>>, vector<1x9x9x16xbf16>
    %1 = vector.shape_cast %0 : vector<1x9x9x16xbf16> to vector<9x9x16xbf16>
    %2 = vector.extract_strided_slice %1 {offsets = [0, 0, 0], sizes = [9, 8, 16], strides = [1, 1, 1]} : vector<9x9x16xbf16> to vector<9x8x16xbf16>
    %3 = vector.extract_strided_slice %1 {offsets = [0, 1, 0], sizes = [9, 8, 16], strides = [1, 1, 1]} : vector<9x9x16xbf16> to vector<9x8x16xbf16>
    %4 = tpu.concatenate %2, %3 in 2 : vector<9x8x16xbf16>, vector<9x8x16xbf16> -> vector<9x8x32xbf16>
    %5 = vector.extract_strided_slice %4 {offsets = [0, 0, 0], sizes = [8, 8, 32], strides = [1, 1, 1]} : vector<9x8x32xbf16> to vector<8x8x32xbf16>
    %6 = vector.shape_cast %5 : vector<8x8x32xbf16> to vector<64x32xbf16>
    %c0_3 = arith.constant 0 : index
    %c0_4 = arith.constant 0 : index
    %c0_5 = arith.constant 0 : index
    %7 = vector.load %arg2[%c0_3, %c0_4, %c0_5] : memref<2x32x32xbf16, #tpu.memory_space<vmem>>, vector<1x32x32xbf16>
    %8 = vector.shape_cast %7 : vector<1x32x32xbf16> to vector<32x32xbf16>
    %cst = arith.constant dense<0.000000e+00> : vector<64x32xf32>
    %9 = tpu.matmul %6, %8, %cst {dimension_numbers = #tpu.dot_dimension_numbers<[1], [0], [0], [1], [0, 0, 1, 1], [], []>} : vector<64x32xbf16>, vector<32x32xbf16>, vector<64x32xf32> -> vector<64x32xf32>
    %10 = vector.extract_strided_slice %4 {offsets = [1, 0, 0], sizes = [8, 8, 32], strides = [1, 1, 1]} : vector<9x8x32xbf16> to vector<8x8x32xbf16>
    %11 = vector.shape_cast %10 : vector<8x8x32xbf16> to vector<64x32xbf16>
    %c1 = arith.constant 1 : index
    %c0_6 = arith.constant 0 : index
    %c0_7 = arith.constant 0 : index
    %12 = vector.load %arg2[%c1, %c0_6, %c0_7] : memref<2x32x32xbf16, #tpu.memory_space<vmem>>, vector<1x32x32xbf16>
    %13 = vector.shape_cast %12 : vector<1x32x32xbf16> to vector<32x32xbf16>
    %cst_8 = arith.constant dense<0.000000e+00> : vector<64x32xf32>
    %14 = tpu.matmul %11, %13, %cst_8 {dimension_numbers = #tpu.dot_dimension_numbers<[1], [0], [0], [1], [0, 0, 1, 1], [], []>} : vector<64x32xbf16>, vector<32x32xbf16>, vector<64x32xf32> -> vector<64x32xf32>
    %15 = arith.addf %9, %14 : vector<64x32xf32>
    %c0_9 = arith.constant 0 : index
    %c0_10 = arith.constant 0 : index
    %16 = vector.load %arg3[%c0_9, %c0_10] : memref<1x32xf32, #tpu.memory_space<vmem>>, vector<1x32xf32>
    %17 = vector.broadcast %16 : vector<1x32xf32> to vector<64x32xf32>
    %18 = arith.addf %15, %17 : vector<64x32xf32>
    %cst_11 = arith.constant 0.000000e+00 : f32
    %19 = vector.broadcast %cst_11 : f32 to vector<64x32xf32>
    %20 = arith.cmpf ogt, %18, %19 : vector<64x32xf32>
    %cst_12 = arith.constant 1.000000e-01 : f32
    %21 = vector.broadcast %cst_12 : f32 to vector<64x32xf32>
    %22 = arith.mulf %21, %18 : vector<64x32xf32>
    %23 = arith.select %20, %18, %22 : vector<64x32xi1>, vector<64x32xf32>
    %24 = vector.shape_cast %23 : vector<64x32xf32> to vector<8x8x32xf32>
    %25 = arith.truncf %24 : vector<8x8x32xf32> to vector<8x8x32xbf16>
    %cst_13 = arith.constant 0.000000e+00 : bf16
    %26 = vector.broadcast %cst_13 : bf16 to vector<8x1x32xbf16>
    %27 = tpu.concatenate %26, %25, %26 in 1 : vector<8x1x32xbf16>, vector<8x8x32xbf16>, vector<8x1x32xbf16> -> vector<8x10x32xbf16>
    %cst_14 = arith.constant 0.000000e+00 : bf16
    %28 = vector.broadcast %cst_14 : bf16 to vector<1x10x32xbf16>
    %29 = tpu.concatenate %28, %27, %28 in 0 : vector<1x10x32xbf16>, vector<8x10x32xbf16>, vector<1x10x32xbf16> -> vector<10x10x32xbf16>
    %30 = vector.extract_strided_slice %29 {offsets = [0, 0, 0], sizes = [10, 8, 32], strides = [1, 1, 1]} : vector<10x10x32xbf16> to vector<10x8x32xbf16>
    %31 = vector.extract_strided_slice %29 {offsets = [0, 1, 0], sizes = [10, 8, 32], strides = [1, 1, 1]} : vector<10x10x32xbf16> to vector<10x8x32xbf16>
    %32 = vector.extract_strided_slice %29 {offsets = [0, 2, 0], sizes = [10, 8, 32], strides = [1, 1, 1]} : vector<10x10x32xbf16> to vector<10x8x32xbf16>
    %33 = tpu.concatenate %30, %31, %32 in 2 : vector<10x8x32xbf16>, vector<10x8x32xbf16>, vector<10x8x32xbf16> -> vector<10x8x96xbf16>
    %34 = vector.extract_strided_slice %33 {offsets = [0, 0, 0], sizes = [8, 8, 96], strides = [1, 1, 1]} : vector<10x8x96xbf16> to vector<8x8x96xbf16>
    %35 = vector.shape_cast %34 : vector<8x8x96xbf16> to vector<64x96xbf16>
    %c0_15 = arith.constant 0 : index
    %c0_16 = arith.constant 0 : index
    %c0_17 = arith.constant 0 : index
    %36 = vector.load %arg4[%c0_15, %c0_16, %c0_17] : memref<3x96x32xbf16, #tpu.memory_space<vmem>>, vector<1x96x32xbf16>
    %37 = vector.shape_cast %36 : vector<1x96x32xbf16> to vector<96x32xbf16>
    %cst_18 = arith.constant dense<0.000000e+00> : vector<64x32xf32>
    %38 = tpu.matmul %35, %37, %cst_18 {dimension_numbers = #tpu.dot_dimension_numbers<[1], [0], [0], [1], [0, 0, 1, 1], [], []>} : vector<64x96xbf16>, vector<96x32xbf16>, vector<64x32xf32> -> vector<64x32xf32>
    %39 = vector.extract_strided_slice %33 {offsets = [1, 0, 0], sizes = [8, 8, 96], strides = [1, 1, 1]} : vector<10x8x96xbf16> to vector<8x8x96xbf16>
    %40 = vector.shape_cast %39 : vector<8x8x96xbf16> to vector<64x96xbf16>
    %c1_19 = arith.constant 1 : index
    %c0_20 = arith.constant 0 : index
    %c0_21 = arith.constant 0 : index
    %41 = vector.load %arg4[%c1_19, %c0_20, %c0_21] : memref<3x96x32xbf16, #tpu.memory_space<vmem>>, vector<1x96x32xbf16>
    %42 = vector.shape_cast %41 : vector<1x96x32xbf16> to vector<96x32xbf16>
    %cst_22 = arith.constant dense<0.000000e+00> : vector<64x32xf32>
    %43 = tpu.matmul %40, %42, %cst_22 {dimension_numbers = #tpu.dot_dimension_numbers<[1], [0], [0], [1], [0, 0, 1, 1], [], []>} : vector<64x96xbf16>, vector<96x32xbf16>, vector<64x32xf32> -> vector<64x32xf32>
    %44 = arith.addf %38, %43 : vector<64x32xf32>
    %45 = vector.extract_strided_slice %33 {offsets = [2, 0, 0], sizes = [8, 8, 96], strides = [1, 1, 1]} : vector<10x8x96xbf16> to vector<8x8x96xbf16>
    %46 = vector.shape_cast %45 : vector<8x8x96xbf16> to vector<64x96xbf16>
    %c2 = arith.constant 2 : index
    %c0_23 = arith.constant 0 : index
    %c0_24 = arith.constant 0 : index
    %47 = vector.load %arg4[%c2, %c0_23, %c0_24] : memref<3x96x32xbf16, #tpu.memory_space<vmem>>, vector<1x96x32xbf16>
    %48 = vector.shape_cast %47 : vector<1x96x32xbf16> to vector<96x32xbf16>
    %cst_25 = arith.constant dense<0.000000e+00> : vector<64x32xf32>
    %49 = tpu.matmul %46, %48, %cst_25 {dimension_numbers = #tpu.dot_dimension_numbers<[1], [0], [0], [1], [0, 0, 1, 1], [], []>} : vector<64x96xbf16>, vector<96x32xbf16>, vector<64x32xf32> -> vector<64x32xf32>
    %50 = arith.addf %44, %49 : vector<64x32xf32>
    %c0_26 = arith.constant 0 : index
    %c0_27 = arith.constant 0 : index
    %51 = vector.load %arg5[%c0_26, %c0_27] : memref<1x32xf32, #tpu.memory_space<vmem>>, vector<1x32xf32>
    %52 = vector.broadcast %51 : vector<1x32xf32> to vector<64x32xf32>
    %53 = arith.addf %50, %52 : vector<64x32xf32>
    %cst_28 = arith.constant 0.000000e+00 : f32
    %54 = vector.broadcast %cst_28 : f32 to vector<64x32xf32>
    %55 = arith.cmpf ogt, %53, %54 : vector<64x32xf32>
    %cst_29 = arith.constant 1.000000e-01 : f32
    %56 = vector.broadcast %cst_29 : f32 to vector<64x32xf32>
    %57 = arith.mulf %56, %53 : vector<64x32xf32>
    %58 = arith.select %55, %53, %57 : vector<64x32xi1>, vector<64x32xf32>
    %59 = vector.shape_cast %58 : vector<64x32xf32> to vector<8x8x32xf32>
    %60 = arith.truncf %59 : vector<8x8x32xf32> to vector<8x8x32xbf16>
    %cst_30 = arith.constant 0.000000e+00 : bf16
    %61 = vector.broadcast %cst_30 : bf16 to vector<8x1x32xbf16>
    %62 = tpu.concatenate %61, %60, %61 in 1 : vector<8x1x32xbf16>, vector<8x8x32xbf16>, vector<8x1x32xbf16> -> vector<8x10x32xbf16>
    %cst_31 = arith.constant 0.000000e+00 : bf16
    %63 = vector.broadcast %cst_31 : bf16 to vector<1x10x32xbf16>
    %64 = tpu.concatenate %63, %62, %63 in 0 : vector<1x10x32xbf16>, vector<8x10x32xbf16>, vector<1x10x32xbf16> -> vector<10x10x32xbf16>
    %65 = vector.extract_strided_slice %64 {offsets = [0, 0, 0], sizes = [10, 8, 32], strides = [1, 1, 1]} : vector<10x10x32xbf16> to vector<10x8x32xbf16>
    %66 = vector.extract_strided_slice %64 {offsets = [0, 1, 0], sizes = [10, 8, 32], strides = [1, 1, 1]} : vector<10x10x32xbf16> to vector<10x8x32xbf16>
    %67 = vector.extract_strided_slice %64 {offsets = [0, 2, 0], sizes = [10, 8, 32], strides = [1, 1, 1]} : vector<10x10x32xbf16> to vector<10x8x32xbf16>
    %68 = tpu.concatenate %65, %66, %67 in 2 : vector<10x8x32xbf16>, vector<10x8x32xbf16>, vector<10x8x32xbf16> -> vector<10x8x96xbf16>
    %69 = vector.extract_strided_slice %68 {offsets = [0, 0, 0], sizes = [8, 8, 96], strides = [1, 1, 1]} : vector<10x8x96xbf16> to vector<8x8x96xbf16>
    %70 = vector.shape_cast %69 : vector<8x8x96xbf16> to vector<64x96xbf16>
    %c0_32 = arith.constant 0 : index
    %c0_33 = arith.constant 0 : index
    %c0_34 = arith.constant 0 : index
    %71 = vector.load %arg6[%c0_32, %c0_33, %c0_34] : memref<3x96x32xbf16, #tpu.memory_space<vmem>>, vector<1x96x32xbf16>
    %72 = vector.shape_cast %71 : vector<1x96x32xbf16> to vector<96x32xbf16>
    %cst_35 = arith.constant dense<0.000000e+00> : vector<64x32xf32>
    %73 = tpu.matmul %70, %72, %cst_35 {dimension_numbers = #tpu.dot_dimension_numbers<[1], [0], [0], [1], [0, 0, 1, 1], [], []>} : vector<64x96xbf16>, vector<96x32xbf16>, vector<64x32xf32> -> vector<64x32xf32>
    %74 = vector.extract_strided_slice %68 {offsets = [1, 0, 0], sizes = [8, 8, 96], strides = [1, 1, 1]} : vector<10x8x96xbf16> to vector<8x8x96xbf16>
    %75 = vector.shape_cast %74 : vector<8x8x96xbf16> to vector<64x96xbf16>
    %c1_36 = arith.constant 1 : index
    %c0_37 = arith.constant 0 : index
    %c0_38 = arith.constant 0 : index
    %76 = vector.load %arg6[%c1_36, %c0_37, %c0_38] : memref<3x96x32xbf16, #tpu.memory_space<vmem>>, vector<1x96x32xbf16>
    %77 = vector.shape_cast %76 : vector<1x96x32xbf16> to vector<96x32xbf16>
    %cst_39 = arith.constant dense<0.000000e+00> : vector<64x32xf32>
    %78 = tpu.matmul %75, %77, %cst_39 {dimension_numbers = #tpu.dot_dimension_numbers<[1], [0], [0], [1], [0, 0, 1, 1], [], []>} : vector<64x96xbf16>, vector<96x32xbf16>, vector<64x32xf32> -> vector<64x32xf32>
    %79 = arith.addf %73, %78 : vector<64x32xf32>
    %80 = vector.extract_strided_slice %68 {offsets = [2, 0, 0], sizes = [8, 8, 96], strides = [1, 1, 1]} : vector<10x8x96xbf16> to vector<8x8x96xbf16>
    %81 = vector.shape_cast %80 : vector<8x8x96xbf16> to vector<64x96xbf16>
    %c2_40 = arith.constant 2 : index
    %c0_41 = arith.constant 0 : index
    %c0_42 = arith.constant 0 : index
    %82 = vector.load %arg6[%c2_40, %c0_41, %c0_42] : memref<3x96x32xbf16, #tpu.memory_space<vmem>>, vector<1x96x32xbf16>
    %83 = vector.shape_cast %82 : vector<1x96x32xbf16> to vector<96x32xbf16>
    %cst_43 = arith.constant dense<0.000000e+00> : vector<64x32xf32>
    %84 = tpu.matmul %81, %83, %cst_43 {dimension_numbers = #tpu.dot_dimension_numbers<[1], [0], [0], [1], [0, 0, 1, 1], [], []>} : vector<64x96xbf16>, vector<96x32xbf16>, vector<64x32xf32> -> vector<64x32xf32>
    %85 = arith.addf %79, %84 : vector<64x32xf32>
    %c0_44 = arith.constant 0 : index
    %c0_45 = arith.constant 0 : index
    %86 = vector.load %arg7[%c0_44, %c0_45] : memref<1x32xf32, #tpu.memory_space<vmem>>, vector<1x32xf32>
    %87 = vector.broadcast %86 : vector<1x32xf32> to vector<64x32xf32>
    %88 = arith.addf %85, %87 : vector<64x32xf32>
    %cst_46 = arith.constant 0.000000e+00 : f32
    %89 = vector.broadcast %cst_46 : f32 to vector<64x32xf32>
    %90 = arith.cmpf ogt, %88, %89 : vector<64x32xf32>
    %cst_47 = arith.constant 1.000000e-01 : f32
    %91 = vector.broadcast %cst_47 : f32 to vector<64x32xf32>
    %92 = arith.mulf %91, %88 : vector<64x32xf32>
    %93 = arith.select %90, %88, %92 : vector<64x32xi1>, vector<64x32xf32>
    %94 = vector.shape_cast %93 : vector<64x32xf32> to vector<8x8x32xf32>
    %95 = vector.extract_strided_slice %94 {offsets = [0, 0, 0], sizes = [8, 1, 32], strides = [1, 1, 1]} : vector<8x8x32xf32> to vector<8x1x32xf32>
    %96 = vector.shape_cast %95 : vector<8x1x32xf32> to vector<8x32xf32>
    %97 = vector.extract_strided_slice %94 {offsets = [0, 1, 0], sizes = [8, 1, 32], strides = [1, 1, 1]} : vector<8x8x32xf32> to vector<8x1x32xf32>
    %98 = vector.shape_cast %97 : vector<8x1x32xf32> to vector<8x32xf32>
    %99 = vector.extract_strided_slice %94 {offsets = [0, 2, 0], sizes = [8, 1, 32], strides = [1, 1, 1]} : vector<8x8x32xf32> to vector<8x1x32xf32>
    %100 = vector.shape_cast %99 : vector<8x1x32xf32> to vector<8x32xf32>
    %101 = vector.extract_strided_slice %94 {offsets = [0, 3, 0], sizes = [8, 1, 32], strides = [1, 1, 1]} : vector<8x8x32xf32> to vector<8x1x32xf32>
    %102 = vector.shape_cast %101 : vector<8x1x32xf32> to vector<8x32xf32>
    %103 = vector.extract_strided_slice %94 {offsets = [0, 4, 0], sizes = [8, 1, 32], strides = [1, 1, 1]} : vector<8x8x32xf32> to vector<8x1x32xf32>
    %104 = vector.shape_cast %103 : vector<8x1x32xf32> to vector<8x32xf32>
    %105 = vector.extract_strided_slice %94 {offsets = [0, 5, 0], sizes = [8, 1, 32], strides = [1, 1, 1]} : vector<8x8x32xf32> to vector<8x1x32xf32>
    %106 = vector.shape_cast %105 : vector<8x1x32xf32> to vector<8x32xf32>
    %107 = vector.extract_strided_slice %94 {offsets = [0, 6, 0], sizes = [8, 1, 32], strides = [1, 1, 1]} : vector<8x8x32xf32> to vector<8x1x32xf32>
    %108 = vector.shape_cast %107 : vector<8x1x32xf32> to vector<8x32xf32>
    %109 = vector.extract_strided_slice %94 {offsets = [0, 7, 0], sizes = [8, 1, 32], strides = [1, 1, 1]} : vector<8x8x32xf32> to vector<8x1x32xf32>
    %110 = vector.shape_cast %109 : vector<8x1x32xf32> to vector<8x32xf32>
    %111 = tpu.concatenate %96, %98, %100, %102, %104, %106, %108, %110 in 1 : vector<8x32xf32>, vector<8x32xf32>, vector<8x32xf32>, vector<8x32xf32>, vector<8x32xf32>, vector<8x32xf32>, vector<8x32xf32>, vector<8x32xf32> -> vector<8x256xf32>
    %c0_48 = arith.constant 0 : index
    %c0_49 = arith.constant 0 : index
    %c0_50 = arith.constant 0 : index
    %112 = vector.load %arg8[%c0_48, %c0_49, %c0_50] : memref<1x8x256xf32, #tpu.memory_space<vmem>>, vector<1x8x256xf32>
    %113 = vector.shape_cast %112 : vector<1x8x256xf32> to vector<8x256xf32>
    %114 = vector.shape_cast %111 : vector<8x256xf32> to vector<1x8x256xf32>
    tpu.vector_store %arg8[%c0_48, %c0_49, %c0_50], %114 {strides = array<i32>} : memref<1x8x256xf32, #tpu.memory_space<vmem>>, vector<1x8x256xf32>,
    return
  }
  func.func @transform_0(%arg0: i32) -> (i32, i32, i32, i32) {
    %c0_i32 = arith.constant 0 : i32
    %c0_i32_0 = arith.constant 0 : i32
    %c0_i32_1 = arith.constant 0 : i32
    %c0_i32_2 = arith.constant 0 : i32
    return %arg0, %c0_i32, %c0_i32_0, %c0_i32_1 : i32, i32, i32, i32
  }
  func.func @transform_1(%arg0: i32) -> (i32, i32, i32) {
    %c0_i32 = arith.constant 0 : i32
    %c0_i32_0 = arith.constant 0 : i32
    %c0_i32_1 = arith.constant 0 : i32
    %c0_i32_2 = arith.constant 0 : i32
    return %c0_i32, %c0_i32_0, %c0_i32_1 : i32, i32, i32
  }
  func.func @transform_2(%arg0: i32) -> (i32, i32) {
    %c0_i32 = arith.constant 0 : i32
    %c0_i32_0 = arith.constant 0 : i32
    %c0_i32_1 = arith.constant 0 : i32
    return %c0_i32, %c0_i32_0 : i32, i32
  }
  func.func @transform_3(%arg0: i32) -> (i32, i32, i32) {
    %c0_i32 = arith.constant 0 : i32
    %c0_i32_0 = arith.constant 0 : i32
    %c0_i32_1 = arith.constant 0 : i32
    %c0_i32_2 = arith.constant 0 : i32
    return %c0_i32, %c0_i32_0, %c0_i32_1 : i32, i32, i32
  }
  func.func @transform_4(%arg0: i32) -> (i32, i32) {
    %c0_i32 = arith.constant 0 : i32
    %c0_i32_0 = arith.constant 0 : i32
    %c0_i32_1 = arith.constant 0 : i32
    return %c0_i32, %c0_i32_0 : i32, i32
  }
  func.func @transform_5(%arg0: i32) -> (i32, i32, i32) {
    %c0_i32 = arith.constant 0 : i32
    %c0_i32_0 = arith.constant 0 : i32
    %c0_i32_1 = arith.constant 0 : i32
    %c0_i32_2 = arith.constant 0 : i32
    return %c0_i32, %c0_i32_0, %c0_i32_1 : i32, i32, i32
  }
  func.func @transform_6(%arg0: i32) -> (i32, i32) {
    %c0_i32 = arith.constant 0 : i32
    %c0_i32_0 = arith.constant 0 : i32
    %c0_i32_1 = arith.constant 0 : i32
    return %c0_i32, %c0_i32_0 : i32, i32
  }
  func.func @transform_7(%arg0: i32) -> (i32, i32, i32) {
    %c0_i32 = arith.constant 0 : i32
    %c0_i32_0 = arith.constant 0 : i32
    %c0_i32_1 = arith.constant 0 : i32
    return %arg0, %c0_i32, %c0_i32_0 : i32, i32, i32
  }
}

</mosaic_0001>

<bundles_post_ra>
// kernel: tpu_custom_call.1
= control target key start
LH: loop header
LB: loop body
LE: loop exit
PB: predicated region body
PF: predicated region fallthrough
CT: control target
= control target key end

     0   :  { %12 = vsyncpa [#allocation3], 0  ;;  %s3670_s0 = inlined_call_operand.vmem [shape: bf16[2,9,9,16], index: 0, kind: input, shape index: {}]   ;;  %s3671_s1 = inlined_call_operand.vmem [shape: bf16[2,32,32], index: 1, kind: input, shape index: {}]   ;;  %s3672_s2 = inlined_call_operand.vmem [shape: f32[1,32], index: 2, kind: input, shape index: {}]   ;;  %s3673_s3 = inlined_call_operand.vmem [shape: bf16[3,96,32], index: 3, kind: input, shape index: {}]   ;;  %s3674_s4 = inlined_call_operand.vmem [shape: f32[1,32], index: 4, kind: input, shape index: {}]   ;;  %s3675_s5 = inlined_call_operand.vmem [shape: bf16[3,96,32], index: 5, kind: input, shape index: {}]   ;;  %s3676_s6 = inlined_call_operand.vmem [shape: f32[1,32], index: 6, kind: input, shape index: {}]   ;;  %s3677_s7 = inlined_call_operand.hbm [shape: f32[2,8,256], index: 7, kind: output, shape index: {}]  }
   0x1   :  { %14 = vsyncpa [#allocation3 + $0x1], 0  ;;  %s2921_s24 = smov 0   ;;  %s2923_s25 = smov 0  }
   0x2   :  { %s2925_s26 = smov 0   ;;  %s2927_s27 = smov 0  }
   0x3 LB: > { %s2942_s28 = sadd.s32 4294967295, %s2873_s27   ;;  %s2287_s29 = sadd.s32 4294967294, %s2873_s27   ;;  %s2873_s27 = sphi %s2927_s27, %s3687_s27   ;;  %s2869_s26 = sphi %s2925_s26, %s3686_s26   ;;  %s2865_s25 = sphi %s2923_s25, %s3685_s25   ;;  %s2861_s24 = sphi %s2921_s24, %s3684_s24  }
   0x4   : > { %s2946_s30 = sadd.s32 1, %s2873_s27   ;;  %s179_s8 = sadd.s32 1, %s2869_s26 }
   0x5   : > { %s176_s9 = ssub.s32 %s2873_s27, %s2946_s30  ;;  %p189_p0 = scmp.ne.s32.totalorder %s2869_s26, %s2865_s25 }
   0x6   : > { %p177_p1 = scmp.eq.s32.totalorder %s176_s9, 0  ;;  %p190_p2 = scmp.eq.s32.totalorder %s2942_s28, 1 }
   0x7   : > { %p195_p3 = scmp.ne.s32.totalorder %s2865_s25, %s2861_s24  ;;  %p196_p4 = scmp.eq.s32.totalorder %s2287_s29, 1 }
   0x8   : > { %s2957_s10 = scalar_select %p177_p1, %s2869_s26, %s179_s8  }
   0x9   : > { %p2959_p5 = por %p190_p2, %p189_p0  ;;  %p2963_p6 = por %p196_p4, %p195_p3 }
   0xa   : > { %p2290_p7 = scmp.ge.s32.totalorder %s2873_s27, 1  ;;  %p240_p8 = scmp.lt.s32.totalorder %s2873_s27, 3 }
   0xc   : > { %p241_p9 = pnand %p2290_p7, %p240_p8 }
   0xd   : > { %p272_p10 = scmp.lt.s32.totalorder (!%p241_p9), %s2942_s28, 1  ;;  %v2771_v0 = vld [vmem:[%s3671_s1] sm:$0xff] (!%p241_p9)   ;;  %v2772_v1 = vld [vmem:[%s3671_s1 + $0x10] sm:$0xff] (!%p241_p9)   ;;  %v2773_v2 = vld [vmem:[%s3671_s1 + $0x8] sm:$0xff] (!%p241_p9)   ;;  %s2875_s9 = smov (!%p241_p9), 16   ;;  %vm422_vm0 = vcmask (!%p241_p9), 130048  }
   0xe   : > { %244 = sbr.rel (%p241_p9) target bundleno = 1371 (0x55b), region = 48  ;;  %2545 = vmatprep.subr.bf16.mxu0 (!%p241_p9), %v2771_v0  ;;  %2533 = vmatprep.subr.bf16.mxu1 (!%p241_p9), %v2772_v1  ;;  %v2774_v30 = vld [vmem:[%s3671_s1 + $0x18] sm:$0xff] (!%p241_p9)   ;;  %vm491_vm1 = vcmask (!%p241_p9), 261120   ;;  %vm775_vm4 = vcmask (!%p241_p9), 1040384   ;;  %vm776_vm6 = vsmask.f32 (!%p241_p9), 256 }
   0xf   : > { %2546 = vmatpush3.bf16.msra.mxu0 (!%p241_p9), %v2771_v0  ;;  %2534 = vmatpush3.bf16.msra.mxu1 (!%p241_p9), %v2772_v1  ;;  %vm786_vm8 = vcmask (!%p241_p9), 1044480   ;;  %vm787_vm9 = vsmask.f32 (!%p241_p9), 4352  ;;  %vm3090_vm11 = vmand (!%p241_p9), %vm775_vm4, %vm776_vm6  ;;  %s2876_s23 = smov (!%p241_p9), 64   ;;  %s2460_s20 = sshll.u32 (!%p241_p9), %s2942_s28, 8 }
  0x10   : > { %2547 = vmatprep.subr.bf16.mxu0 (!%p241_p9), %v2773_v2  ;;  %2535 = vmatprep.subr.bf16.mxu1 (!%p241_p9), %v2774_v30  ;;  %vm3096_vm12 = vmand (!%p241_p9), %vm786_vm8, %vm787_vm9  ;;  %s2880_s14 = smov (!%p241_p9), [#allocation2]  }
  0x11   : > { %s2815_s15 = sshll.u32 (!%p241_p9), %s2880_s14, 4  ;;  %s2816_s15 = int_to_ptr.vmem [resolvable:$false] %s2815_s15 }
  0x12   : > { %s2817_s17 = scalar_lea.vmem (!%p241_p9), %s2816_s15, 512 }
  0x13   : > { %2548 = vmatpush3.bf16.msra.mxu0 (!%p241_p9), %v2773_v2  ;;  %2536 = vmatpush3.bf16.msra.mxu1 (!%p241_p9), %v2774_v30  ;;  %v2775_v30 = vld [vmem:[%s3673_s3 + $0x30] sm:$0xff] (!%p241_p9)  }
  0x14   : > { %2557 = vmatprep.subr.bf16.mxu1 (!%p241_p9), %v2775_v30 }
  0x15   : > { %s273_s13 = scalar_select %p272_p10, %s2942_s28, 1 }
  0x17   : > { %s2717_s16 = smul.u32 72, %s273_s13 }
  0x19   : > { %s2980_s21 = scalar_lea.vmem %s3670_s0, %s2717_s16  ;;  %s2877_s16 = smov 32  }
  0x1a   : > { %v2986_v3 = vld [vmem:[%s2980_s21 + $0x10] sm:$0xf]  ;;  %v283_v4 = vld [vmem:[%s2980_s21 + $0x14] sm:$0x1]  ;;  %v2990_v5 = vld [vmem:[%s2980_s21] sm:$0xf] }
  0x1b   : > { %v2295_v6 = vcombine.low %v2986_v3, %v283_v4  ;;  %v279_v7 = vld [vmem:[%s2980_s21 + $0x4] sm:$0x1]  ;;  %v2995_v8 = vld [vmem:[%s2980_s21 + $0x18] sm:$0xf]  ;;  %v285_v9 = vld [vmem:[%s2980_s21 + $0x1c] sm:$0x1] }
  0x1c   : > { %v2293_v10 = vcombine.low %v2990_v5, %v279_v7  ;;  %v2296_v11 = vcombine.low %v2995_v8, %v285_v9  ;;  %v3001_v12 = vld [vmem:[%s2980_s21 + $0x8] sm:$0xf]  ;;  %v281_v13 = vld [vmem:[%s2980_s21 + $0xc] sm:$0x1]  ;;  %v3010_v19 = vld [vmem:[%s2980_s21 + $0x20] sm:$0xf] }
  0x1d   : > { %v3005_v14 = vld [vmem:[%s2980_s21 + $0x28] sm:$0xf]  ;;  %v356_v15 = vshrl.u32 %v2295_v6, 16  ;;  %v358_v16 = vshll.u32 %v2295_v6, 16  ;;  %v2294_v17 = vcombine.low %v3001_v12, %v281_v13  ;;  %v289_v18 = vld [vmem:[%s2980_s21 + $0x2c] sm:$0x1] }
  0x1e   : > { %v342_v20 = vshrl.u32 %v2293_v10, 16  ;;  %v344_v21 = vshll.u32 %v2293_v10, 16  ;;  %v363_v22 = vshrl.u32 %v2296_v11, 16  ;;  %v365_v23 = vshll.u32 %v2296_v11, 16  ;;  %v287_v24 = vld [vmem:[%s2980_s21 + $0x24] sm:$0x1] }
  0x1f   : > { %v360_v25 = vrot.slane %v358_v16, 1  ;;  %v349_v26 = vshrl.u32 %v2294_v17, 16  ;;  %v351_v27 = vshll.u32 %v2294_v17, 16  ;;  %v2298_v28 = vcombine.low %v3005_v14, %v289_v18  ;;  %v3015_v29 = vld [vmem:[%s2980_s21 + $0x30] sm:$0xf] }
  0x20   : > { %v346_v31 = vrot.slane %v344_v21, 1  ;;  %v367_v32 = vrot.slane %v365_v23, 1  ;;  %v2297_v33 = vcombine.low %v3010_v19, %v287_v24  ;;  %v291_v34 = vld [vmem:[%s2980_s21 + $0x34] sm:$0x1]  ;;  %v3023_v35 = vld [vmem:[%s2980_s21 + $0x38] sm:$0xf] }
  0x21   : > { %v361_v36 = vor.u32 %v360_v25, %v356_v15  ;;  %v353_v37 = vrot.slane %v351_v27, 1  ;;  %v379_v38 = vshll.u32 %v2298_v28, 16  ;;  %v293_v39 = vld [vmem:[%s2980_s21 + $0x3c] sm:$0x1]  ;;  %v377_v41 = vshrl.u32 %v2298_v28, 16 }
  0x22   : > { %v347_v40 = vor.u32 %v346_v31, %v342_v20  ;;  %v372_v42 = vshll.u32 %v2297_v33, 16  ;;  %v3027_v43 = vld [vmem:[%s2980_s21 + $0x40] sm:$0xf]  ;;  %v295_v44 = vld [vmem:[%s2980_s21 + $0x44] sm:$0x1]  ;;  %v368_v45 = vor.u32 %v367_v32, %v363_v22  ;;  %v2299_v47 = vcombine.low %v3015_v29, %v291_v34 }
  0x23   : > { %408 = vrot.lane.b32.xlu1 %v361_v36, %s2875_s9  ;;  %v381_v46 = vrot.slane %v379_v38, 1  ;;  %v2300_v48 = vcombine.low %v3023_v35, %v293_v39  ;;  %v354_v49 = vor.u32 %v353_v37, %v349_v26  ;;  %v370_v50 = vshrl.u32 %v2297_v33, 16 }
  0x24   : > { %404 = vrot.lane.b32.xlu0 %v347_v40, %s2875_s9  ;;  %v374_v51 = vrot.slane %v372_v42, 1  ;;  %v2301_v52 = vcombine.low %v3027_v43, %v295_v44  ;;  %v386_v53 = vshll.u32 %v2299_v47, 16  ;;  %v384_v54 = vshrl.u32 %v2299_v47, 16 }
  0x25   : > { %v391_v55 = vshrl.u32 %v2300_v48, 16  ;;  %v393_v56 = vshll.u32 %v2300_v48, 16  ;;  %v382_v58 = vor.u32 %v381_v46, %v377_v41 }
  0x26   : > { %v400_v57 = vshll.u32 %v2301_v52, 16  ;;  %v388_v59 = vrot.slane %v386_v53, 1  ;;  %v398_v60 = vshrl.u32 %v2301_v52, 16  ;;  %v375_v61 = vor.u32 %v374_v51, %v370_v50 }
  0x27   : > { %410 = vrot.lane.b32.xlu1 %v368_v45, %s2875_s9  ;;  %v395_v62 = vrot.slane %v393_v56, 1 }
  0x28   : > { %406 = vrot.lane.b32.xlu0 %v354_v49, %s2875_s9  ;;  %v402_v63 = vrot.slane %v400_v57, 1  ;;  %v389_v1 = vor.u32 %v388_v59, %v384_v54 }
  0x29   : > { %v396_v0 = vor.u32 %v395_v62, %v391_v55 }
  0x2a   : > { %v403_v2 = vor.u32 %v402_v63, %v398_v60  ;;  %v2777_v60 = vld [vmem:[%s3673_s3 + $0x40] sm:$0xff]  }
  0x2b   : > { %414 = vrot.lane.b32.xlu1 %v382_v58, %s2875_s9 }
  0x2c   : > { %412 = vrot.lane.b32.xlu0 %v375_v61, %s2875_s9 }
  0x2f   : > { %418 = vrot.lane.b32.xlu1 %v396_v0, %s2875_s9 }
  0x30   : > { %416 = vrot.lane.b32.xlu0 %v389_v1, %s2875_s9 }
  0x34   : > { %420 = vrot.lane.b32.xlu0 %v403_v2, %s2875_s9  ;;  %s3627_s9 = scalar_lea.hbm %s3677_s7, %s2460_s20 }
  0x95   : > { %v409_v4 = vpop.permute.xlu1 %408 }
  0x96   : > { %v405_v6 = vpop.permute.xlu0 %404  ;;  %v431_v7 = vsel %vm422_vm0, %v2986_v3, %v409_v4 }
  0x97   : > { %v425_v13 = vsel %vm422_vm0, %v2990_v5, %v405_v6 }
  0x99   : > { %v411_v9 = vpop.permute.xlu1 %410 }
  0x9a   : > { %v434_v10 = vsel %vm422_vm0, %v2995_v8, %v411_v9  ;;  %v407_v11 = vpop.permute.xlu0 %406 }
  0x9b   : > { %v2317_v15 = vcombine.low %v431_v7, %v434_v10  ;;  %v428_v16 = vsel %vm422_vm0, %v3001_v12, %v407_v11 }
  0x9c   : > { %v2306_v17 = vcombine.low %v428_v16, %v431_v7  ;;  %v2316_v18 = vcombine.low %v425_v13, %v428_v16 }
  0x9d   : > { %v415_v20 = vpop.permute.xlu1 %414 }
  0x9e   : > { %v440_v21 = vsel %vm422_vm0, %v3005_v14, %v415_v20  ;;  %2537 = vmatprep.mubr.msk.bf16.mxu1 %vm491_vm1, %v2306_v17  ;;  %2549 = vmatprep.mubr.msk.bf16.mxu0 %vm491_vm1, %v2316_v18  ;;  %v413_v3 = vpop.permute.xlu0 %412 }
  0x9f   : > { %v437_v8 = vsel %vm422_vm0, %v3010_v19, %v413_v3  ;;  %2550 = vmatmul.mubr.msk.bf16.vlgmr.msra.gmra.mrb[0].mxu0 %vm491_vm1, %v2317_v15 }
  0xa0   : > { %v2307_v5 = vcombine.low %v434_v10, %v437_v8  ;;  %v2318_v22 = vcombine.low %v437_v8, %v440_v21 }
  0xa1   : > { %v419_v12 = vpop.permute.xlu1 %418 }
  0xa2   : > { %2538 = vmatmul.mubr.msk.bf16.vlgmr.msra.gmra.mrb[0].mxu1 %vm491_vm1, %v2307_v5  ;;  %2553 = vmatprep.mubr.msk.bf16.mxu0 %vm491_vm1, %v2318_v22  ;;  %v417_v23 = vpop.permute.xlu0 %416  ;;  %v446_v14 = vsel %vm422_vm0, %v3023_v35, %v419_v12  ;;  %v3077_v35 = vld [vmem:[%s3672_s2] ss:$0 sm:$0xff] }
  0xa3   : > { %v443_v24 = vsel %vm422_vm0, %v3015_v29, %v417_v23  ;;  %v2776_v29 = vld [vmem:[%s3673_s3 + $0x38] sm:$0xff]   ;;  %2558 = vmatpush3.bf16.msra.mxu1 %v2775_v30 }
  0xa4   : > { %v2308_v25 = vcombine.low %v440_v21, %v443_v24  ;;  %v2319_v26 = vcombine.low %v443_v24, %v446_v14  ;;  %2559 = vmatprep.subr.bf16.mxu1 %v2776_v29 }
  0xa6   : > { %v421_v27 = vpop.permute.xlu0 %420  ;;  %2541 = vmatprep.mubr.msk.bf16.mxu1 %vm491_vm1, %v2308_v25 }
  0xa7   : > { %v449_v19 = vsel %vm422_vm0, %v3027_v43, %v421_v27  ;;  %2554 = vmatmul.mubr.msk.bf16.gmra.mrb[4].mxu0 %vm491_vm1, %v2319_v26  ;;  %2560 = vmatpush3.bf16.msra.mxu1 %v2776_v29  ;;  %vm932_vm0 = vcmask 523264  }
  0xa8   : > { %v2309_v28 = vcombine.low %v446_v14, %v449_v19  ;;  %2561 = vmatprep.subr.bf16.mxu1 %v2777_v60 }
  0xaa   : > { %2542 = vmatmul.mubr.msk.bf16.gmra.mrb[4].mxu1 %vm491_vm1, %v2309_v28 }
  0xab   : > { %2562 = vmatpush3.bf16.msra.mxu1 %v2777_v60 }
 0x172   : > { %v2551_v31 = vpop.f32.mrb[0].mxu0 }
 0x173   : > { %v633_v32 = vpop.f32.mrb[1].mxu0 }
 0x174   : > { %v2552_v33 = vpop.f32.mrb[2].mxu0 }
 0x175   : > { %v2539_v34 = vpop.f32.mrb[0].mxu1  ;;  %v636_v36 = vpop.f32.mrb[3].mxu0 }
 0x176   : > { %v642_v37 = vadd.f32 %v2551_v31, %v2539_v34  ;;  %v538_v38 = vpop.f32.mrb[1].mxu1  ;;  %v2778_v34 = vld [vmem:[%s3673_s3 + $0x48] sm:$0xff]  }
 0x177   : > { %v634_v39 = vadd.f32 %v633_v32, %v538_v38  ;;  %v2540_v40 = vpop.f32.mrb[2].mxu1  ;;  %2563 = vmatprep.subr.bf16.mxu1 %v2778_v34 }
 0x178   : > { %v673_v41 = vadd.f32 %v3077_v35, %v642_v37  ;;  %v645_v42 = vadd.f32 %v2552_v33, %v2540_v40  ;;  %v541_v43 = vpop.f32.mrb[3].mxu1  ;;  %2564 = vmatpush3.bf16.msra.mxu1 %v2778_v34 }
 0x179   : > { %v671_v44 = vadd.f32 %v3077_v35, %v634_v39  ;;  %v637_v45 = vadd.f32 %v636_v36, %v541_v43 }
 0x17a   : > { %vm681_vm2 = vcmp.gt.f32.partialorder %v673_v41, 0.0  ;;  %v689_v46 = vmul.f32 0.1, %v673_v41  ;;  %v674_v47 = vadd.f32 %v3077_v35, %v645_v42  ;;  %v2555_v48 = vpop.f32.mrb[4].mxu0 }
 0x17b   : > { %vm679_vm3 = vcmp.gt.f32.partialorder %v671_v44, 0.0  ;;  %v687_v49 = vmul.f32 0.1, %v671_v44  ;;  %v672_v50 = vadd.f32 %v3077_v35, %v637_v45  ;;  %v649_v51 = vpop.f32.mrb[5].mxu0 }
 0x17c   : > { %v697_v52 = vsel %vm681_vm2, %v673_v41, %v689_v46  ;;  %vm682_vm5 = vcmp.gt.f32.partialorder %v674_v47, 0.0  ;;  %v690_v53 = vmul.f32 0.1, %v674_v47  ;;  %v2556_v54 = vpop.f32.mrb[6].mxu0  ;;  %vm1032_vm2 = vcmask 785408  }
 0x17d   : > { %v705_v55 = vpack.c.bf16 %v697_v52, %v697_v52  ;;  %v695_v56 = vsel %vm679_vm3, %v671_v44, %v687_v49  ;;  %vm680_vm7 = vcmp.gt.f32.partialorder %v672_v50, 0.0  ;;  %v688_v57 = vmul.f32 0.1, %v672_v50  ;;  %v2543_v58 = vpop.f32.mrb[4].mxu1  ;;  %v652_v59 = vpop.f32.mrb[7].mxu0 }
 0x17e   : > { %v703_v61 = vpack.c.bf16 %v695_v56, %v695_v56  ;;  %v698_v62 = vsel %vm682_vm5, %v674_v47, %v690_v53  ;;  %v658_v63 = vadd.f32 %v2555_v48, %v2543_v58  ;;  %v554_v0 = vpop.f32.mrb[5].mxu1 }
 0x17f   : > { %v726_v1 = vshrl.u32 %v705_v55, 16  ;;  %v706_v2 = vpack.c.bf16 %v698_v62, %v698_v62  ;;  %v696_v4 = vsel %vm680_vm7, %v672_v50, %v688_v57  ;;  %v2544_v6 = vpop.f32.mrb[6].mxu1  ;;  %v729_v7 = vshll.u32 %v705_v55, 16 }
 0x180   : > { %v712_v9 = vshrl.u32 %v703_v61, 16  ;;  %v704_v10 = vpack.c.bf16 %v696_v4, %v696_v4  ;;  %v677_v11 = vadd.f32 %v3077_v35, %v658_v63  ;;  %v557_v13 = vpop.f32.mrb[7].mxu1  ;;  %v715_v16 = vshll.u32 %v703_v61, 16  ;;  %v2780_v4 = vld [vmem:[%s3673_s3 + $0x58] sm:$0xff]  }
 0x181   : > { %v728_v15 = vrot.slane %v726_v1, 7  ;;  %v733_v17 = vshrl.u32 %v706_v2, 16  ;;  %v650_v18 = vadd.f32 %v649_v51, %v554_v0  ;;  %v736_v21 = vshll.u32 %v706_v2, 16  ;;  %v2779_v51 = vld [vmem:[%s3673_s3 + $0x50] sm:$0xff]  }
 0x182   : > { %v714_v20 = vrot.slane %v712_v9, 7  ;;  %v719_v3 = vshrl.u32 %v704_v10, 16  ;;  %vm685_vm10 = vcmp.gt.f32.partialorder %v677_v11, 0.0  ;;  %v693_v22 = vmul.f32 0.1, %v677_v11  ;;  %2565 = vmatprep.subr.bf16.mxu1 %v2779_v51 }
 0x183   : > { %v731_v8 = vor.u32 %v729_v7, %v728_v15  ;;  %v735_v5 = vrot.slane %v733_v17, 7  ;;  %v675_v12 = vadd.f32 %v3077_v35, %v650_v18  ;;  %v661_v24 = vadd.f32 %v2556_v54, %v2544_v6  ;;  %2566 = vmatpush3.bf16.msra.mxu1 %v2779_v51 }
 0x184   : > { %v721_v14 = vrot.slane %v719_v3, 7  ;;  %v653_v25 = vadd.f32 %v652_v59, %v557_v13  ;;  %v717_v26 = vor.u32 %v715_v16, %v714_v20  ;;  %v722_v19 = vshll.u32 %v704_v10, 16  ;;  %2567 = vmatprep.subr.bf16.mxu1 %v2780_v4 }
 0x185   : > { %v701_v28 = vsel %vm685_vm10, %v677_v11, %v693_v22  ;;  %vm683_vm13 = vcmp.gt.f32.partialorder %v675_v12, 0.0  ;;  %v691_v30 = vmul.f32 0.1, %v675_v12  ;;  %v678_v31 = vadd.f32 %v3077_v35, %v661_v24 }
 0x186   : > { %v709_v29 = vpack.c.bf16 %v701_v28, %v701_v28  ;;  %v676_v32 = vadd.f32 %v3077_v35, %v653_v25  ;;  %v778_v33 = vsel %vm3090_vm11, 0, %v717_v26  ;;  %v738_v36 = vor.u32 %v736_v21, %v735_v5  ;;  %v3148_v21 = vld [vmem:[%s3673_s3] sm:$0xff]  }
 0x187   : > { %v699_v37 = vsel %vm683_vm13, %v675_v12, %v691_v30  ;;  %v3109_v38 = vsel %vm3096_vm12, %v778_v33, 0  ;;  %v724_v39 = vor.u32 %v722_v19, %v721_v14  ;;  %vm686_vm14 = vcmp.gt.f32.partialorder %v678_v31, 0.0  ;;  %2568 = vmatpush3.bf16.msra.mxu1 %v2780_v4 }
 0x188   : > { %v754_v40 = vshrl.u32 %v709_v29, 16  ;;  %v707_v41 = vpack.c.bf16 %v699_v37, %v699_v37  ;;  %v780_v35 = vsel %vm3090_vm11, 0, %v731_v8  ;;  %v694_v42 = vmul.f32 0.1, %v678_v31  ;;  %2577 = vmatprep.subr.bf16.mxu1 %v3148_v21 }
 0x189   : > { %vm684_vm15 = vcmp.gt.f32.partialorder %v676_v32, 0.0  ;;  %v692_v43 = vmul.f32 0.1, %v676_v32  ;;  %v888_v44 = vrot.slane %v3109_v38, 1  ;;  %v779_v46 = vsel %vm3090_vm11, 0, %v724_v39 }
 0x18a   : > { %v740_v45 = vshrl.u32 %v707_v41, 16  ;;  %v702_v47 = vsel %vm686_vm14, %v678_v31, %v694_v42  ;;  %v3119_v49 = vsel %vm3096_vm12, %v779_v46, 0  ;;  %v3123_v50 = vsel %vm3096_vm12, %v780_v35, 0 }
 0x18b   : > { %v700_v48 = vsel %vm684_vm15, %v676_v32, %v692_v43  ;;  %898 = vrot.lane.b32.xlu1 %v888_v44, %s2876_s23  ;;  %v756_v52 = vrot.slane %v754_v40, 7  ;;  %v757_v53 = vshll.u32 %v709_v29, 16  ;;  %v710_v54 = vpack.c.bf16 %v702_v47, %v702_v47 }
 0x18c   : > { %v708_v55 = vpack.c.bf16 %v700_v48, %v700_v48  ;;  %v889_v56 = vrot.slane %v3119_v49, 1  ;;  %v821_v57 = vshll.u32 %v3123_v50, 16  ;;  %v781_v58 = vsel %vm3090_vm11, 0, %v738_v36 }
 0x18d   : > { %v742_v59 = vrot.slane %v740_v45, 7  ;;  %v743_v60 = vshll.u32 %v707_v41, 16  ;;  %v761_v61 = vshrl.u32 %v710_v54, 16  ;;  %v819_v63 = vshrl.u32 %v3123_v50, 16 }
 0x18e   : > { %v747_v62 = vshrl.u32 %v708_v55, 16  ;;  %900 = vrot.lane.b32.xlu0 %v889_v56, %s2876_s23  ;;  %v823_v0 = vrot.slane %v821_v57, 1  ;;  %v3136_v1 = vsel %vm3096_vm12, %v781_v58, 0  ;;  %v807_v2 = vshll.u32 %v3109_v38, 16 }
 0x18f   : > { %v759_v6 = vor.u32 %v757_v53, %v756_v52  ;;  %v763_v7 = vrot.slane %v761_v61, 7  ;;  %v764_v9 = vshll.u32 %v710_v54, 16  ;;  %v828_v10 = vshll.u32 %v3136_v1, 16 }
 0x190   : > { %v824_v11 = vor.u32 %v823_v0, %v819_v63  ;;  %v809_v13 = vrot.slane %v807_v2, 1  ;;  %v814_v15 = vshll.u32 %v3119_v49, 16  ;;  %v749_v17 = vrot.slane %v747_v62, 7 }
 0x191   : > { %v766_v16 = vor.u32 %v764_v9, %v763_v7  ;;  %v826_v18 = vshrl.u32 %v3136_v1, 16  ;;  %v830_v20 = vrot.slane %v828_v10, 1  ;;  %v805_v3 = vshrl.u32 %v3109_v38, 16 }
 0x192   : > { %866 = vrot.lane.b32.xlu1 %v824_v11, %s2877_s16  ;;  %v745_v8 = vor.u32 %v743_v60, %v742_v59  ;;  %v750_v5 = vshll.u32 %v708_v55, 16  ;;  %v816_v12 = vrot.slane %v814_v15, 1  ;;  %v784_v14 = vsel %vm3090_vm11, 0, %v759_v6 }
 0x193   : > { %v831_v22 = vor.u32 %v830_v20, %v826_v18  ;;  %v810_v24 = vor.u32 %v809_v13, %v805_v3  ;;  %v812_v25 = vshrl.u32 %v3119_v49, 16  ;;  %v3159_v19 = vsel %vm3096_vm12, %v784_v14, 0  ;;  %v2784_v14 = vld [vmem:[%s3673_s3 + $0x18] sm:$0xff]  }
 0x194   : > { %v752_v26 = vor.u32 %v750_v5, %v749_v17  ;;  %v785_v28 = vsel %vm3090_vm11, 0, %v766_v16  ;;  %v782_v30 = vsel %vm3090_vm11, 0, %v745_v8  ;;  %v890_v31 = vrot.slane %v3123_v50, 1  ;;  %v2782_v8 = vld [vmem:[%s3673_s3 + $0x8] sm:$0xff]  }
 0x195   : > { %868 = vrot.lane.b32.xlu0 %v831_v22, %s2877_s16  ;;  %v817_v29 = vor.u32 %v816_v12, %v812_v25  ;;  %v849_v32 = vshll.u32 %v3159_v19, 16  ;;  %v3170_v33 = vsel %vm3096_vm12, %v785_v28, 0  ;;  %v3175_v34 = vsel %vm3096_vm12, %v782_v30, 0 }
 0x196   : > { %862 = vrot.lane.b32.xlu1 %v810_v24, %s2877_s16  ;;  %v783_v36 = vsel %vm3090_vm11, 0, %v752_v26  ;;  %v891_v37 = vrot.slane %v3136_v1, 1  ;;  %v856_v39 = vshll.u32 %v3170_v33, 16  ;;  %v892_v40 = vrot.slane %v3175_v34, 1 }
 0x197   : > { %v3185_v41 = vsel %vm3096_vm12, %v783_v36, 0  ;;  %v851_v35 = vrot.slane %v849_v32, 1  ;;  %v835_v42 = vshll.u32 %v3175_v34, 16  ;;  %v847_v43 = vshrl.u32 %v3159_v19, 16 }
 0x198   : > { %v893_v44 = vrot.slane %v3185_v41, 1  ;;  %v858_v45 = vrot.slane %v856_v39, 1  ;;  %v842_v46 = vshll.u32 %v3185_v41, 16  ;;  %v854_v51 = vshrl.u32 %v3170_v33, 16 }
 0x199   : > { %864 = vrot.lane.b32.xlu0 %v817_v29, %s2877_s16  ;;  %v852_v47 = vor.u32 %v851_v35, %v847_v43  ;;  %v837_v48 = vrot.slane %v835_v42, 1  ;;  %v833_v52 = vshrl.u32 %v3175_v34, 16  ;;  %v840_v56 = vshrl.u32 %v3185_v41, 16  ;;  %v2785_v29 = vld [vmem:[%s3673_s3 + $0x20] sm:$0xff]  }
 0x19a   : > { %902 = vrot.lane.b32.xlu1 %v890_v31, %s2876_s23  ;;  %v859_v53 = vor.u32 %v858_v45, %v854_v51  ;;  %v844_v54 = vrot.slane %v842_v46, 1  ;;  %v894_v58 = vrot.slane %v3159_v19, 1  ;;  %v2878_v59 = vmov 0   ;;  %v2788_v46 = vld [vmem:[%s3673_s3 + $0x68] sm:$0xff]  }
 0x19b   : > { %v838_v55 = vor.u32 %v837_v48, %v833_v52  ;;  %v802_v60 = vrot.slane %v2878_v59, 1  ;;  %v895_v61 = vrot.slane %v3170_v33, 1  ;;  %v2789_v48 = vld [vmem:[%s3673_s3 + $0x70] sm:$0xff]   ;;  %v2790_v52 = vld [vmem:[%s3673_s3 + $0x78] sm:$0xff]   ;;  %vm2067_vm13 = vcmask 1041409  }
 0x19c   : > { %v845_v57 = vor.u32 %v844_v54, %v840_v56  ;;  %v2792_v54 = vld [vmem:[%s3673_s3 + $0x88] sm:$0xff]   ;;  %v2793_v56 = vld [vmem:[%s3675_s5 + $0x30] sm:$0xff]   ;;  %vm2070_vm15 = vcmask 1042434  }
 0x19d   : > { %904 = vrot.lane.b32.xlu0 %v891_v37, %s2876_s23  ;;  %2617 = vmatprep.subr.bf16.mxu0 %v2793_v56 }
 0x19e   : > { %906 = vrot.lane.b32.xlu1 %v892_v40, %s2876_s23  ;;  %2618 = vmatpush3.bf16.msra.mxu0 %v2793_v56 }
 0x1a1   : > { %908 = vrot.lane.b32.xlu0 %v893_v44, %s2876_s23  ;;  %v2787_v44 = vld [vmem:[%s3673_s3 + $0x60] sm:$0xff]  }
 0x1a2   : > { %874 = vrot.lane.b32.xlu1 %v852_v47, %s2877_s16 }
 0x1a5   : > { %876 = vrot.lane.b32.xlu0 %v859_v53, %s2877_s16  ;;  %v2791_v53 = vld [vmem:[%s3673_s3 + $0x80] sm:$0xff]  }
 0x1a6   : > { %870 = vrot.lane.b32.xlu1 %v838_v55, %s2877_s16 }
 0x1a9   : > { %872 = vrot.lane.b32.xlu0 %v845_v57, %s2877_s16  ;;  %v2794_v57 = vld [vmem:[%s3675_s5 + $0x38] sm:$0xff]  }
 0x1aa   : > { %910 = vrot.lane.b32.xlu1 %v894_v58, %s2876_s23  ;;  %2619 = vmatprep.subr.bf16.mxu0 %v2794_v57  ;;  %v2390_v58 = vld [vmem:[%s3674_s4] ss:$0 sm:$0xff] }
 0x1ab   : > { %2620 = vmatpush3.bf16.msra.mxu0 %v2794_v57 }
 0x1ad   : > { %912 = vrot.lane.b32.xlu0 %v895_v61, %s2876_s23 }
 0x1ae   : > { %860 = vrot.lane.b32.xlu1 %v802_v60, %s2877_s16 }
 0x1b1   : > { %896 = vrot.lane.b32.xlu0 %v802_v60, %s2876_s23 }
 0x1fd   : > { %v899_v62 = vpop.permute.xlu1 %898 }
 0x200   : > { %v901_v63 = vpop.permute.xlu0 %900 }
 0x204   : > { %v867_v0 = vpop.permute.xlu1 %866 }
 0x205   : > { %v921_v16 = vsel %vm491_vm1, %v3123_v50, %v867_v0 }
 0x207   : > { %v869_v2 = vpop.permute.xlu0 %868 }
 0x208   : > { %v863_v4 = vpop.permute.xlu1 %862  ;;  %v923_v17 = vsel %vm491_vm1, %v3136_v1, %v869_v2  ;;  %v2783_v1 = vld [vmem:[%s3673_s3 + $0x10] sm:$0xff]  }
 0x209   : > { %v917_v6 = vsel %vm491_vm1, %v3109_v38, %v863_v4 }
 0x20a   : > { %v936_v11 = vsel %vm932_vm0, %v917_v6, %v899_v62 }
 0x20b   : > { %v865_v7 = vpop.permute.xlu0 %864 }
 0x20c   : > { %v919_v9 = vsel %vm491_vm1, %v3119_v49, %v865_v7  ;;  %v903_v10 = vpop.permute.xlu1 %902 }
 0x20d   : > { %v938_v13 = vsel %vm932_vm0, %v919_v9, %v901_v63  ;;  %v940_v38 = vsel %vm932_vm0, %v921_v16, %v903_v10 }
 0x20e   : > { %v2339_v15 = vcombine.low %v936_v11, %v938_v13  ;;  %v2354_v45 = vcombine.low %v938_v13, %v940_v38 }
 0x20f   : > { %v905_v18 = vpop.permute.xlu0 %904 }
 0x210   : > { %v942_v20 = vsel %vm932_vm0, %v923_v17, %v905_v18  ;;  %2569 = vmatprep.mubr.msk.bf16.mxu1 %vm1032_vm2, %v2339_v15  ;;  %v907_v49 = vpop.permute.xlu1 %906 }
 0x211   : > { %v2340_v3 = vcombine.low %v940_v38, %v942_v20 }
 0x213   : > { %2570 = vmatmul.mubr.msk.bf16.vlgmr.msra.gmra.mrb[8].mxu1 %vm1032_vm2, %v2340_v3  ;;  %v909_v5 = vpop.permute.xlu0 %908  ;;  %v2795_v3 = vld [vmem:[%s3675_s5 + $0x40] sm:$0xff]  }
 0x214   : > { %2578 = vmatpush3.bf16.msra.mxu1 %v3148_v21  ;;  %v875_v50 = vpop.permute.xlu1 %874  ;;  %2621 = vmatprep.subr.bf16.mxu0 %v2795_v3 }
 0x215   : > { %2579 = vmatprep.subr.bf16.mxu1 %v2782_v8  ;;  %v929_v32 = vsel %vm491_vm1, %v3159_v19, %v875_v50  ;;  %v2786_v19 = vld [vmem:[%s3673_s3 + $0x28] sm:$0xff]   ;;  %2622 = vmatpush3.bf16.msra.mxu0 %v2795_v3  ;;  %v2798_v3 = vld [vmem:[%s3675_s5 + $0x58] sm:$0xff]  }
 0x217   : > { %v877_v22 = vpop.permute.xlu0 %876 }
 0x218   : > { %2580 = vmatpush3.bf16.msra.mxu1 %v2782_v8  ;;  %v871_v12 = vpop.permute.xlu1 %870 }
 0x219   : > { %2581 = vmatprep.subr.bf16.mxu1 %v2783_v1  ;;  %v925_v24 = vsel %vm491_vm1, %v3175_v34, %v871_v12  ;;  %v931_v34 = vsel %vm491_vm1, %v3170_v33, %v877_v22 }
 0x21a   : > { %v944_v28 = vsel %vm932_vm0, %v925_v24, %v907_v49 }
 0x21b   : > { %v873_v25 = vpop.permute.xlu0 %872  ;;  %v2355_v47 = vcombine.low %v942_v20, %v944_v28 }
 0x21c   : > { %2582 = vmatpush3.bf16.msra.mxu1 %v2783_v1  ;;  %v927_v21 = vsel %vm491_vm1, %v3185_v41, %v873_v25  ;;  %v911_v26 = vpop.permute.xlu1 %910 }
 0x21d   : > { %v946_v30 = vsel %vm932_vm0, %v927_v21, %v909_v5  ;;  %2583 = vmatprep.subr.bf16.mxu1 %v2784_v14  ;;  %v948_v37 = vsel %vm932_vm0, %v929_v32, %v911_v26 }
 0x21e   : > { %v2341_v31 = vcombine.low %v944_v28, %v946_v30  ;;  %v2356_v51 = vcombine.low %v946_v30, %v948_v37 }
 0x21f   : > { %v913_v36 = vpop.permute.xlu0 %912 }
 0x220   : > { %2584 = vmatpush3.bf16.msra.mxu1 %v2784_v14  ;;  %v950_v39 = vsel %vm932_vm0, %v931_v34, %v913_v36  ;;  %2573 = vmatprep.mubr.msk.bf16.mxu1 %vm1032_vm2, %v2341_v31  ;;  %v861_v40 = vpop.permute.xlu1 %860 }
 0x221   : > { %v2342_v41 = vcombine.low %v948_v37, %v950_v39  ;;  %v915_v35 = vsel %vm491_vm1, 0, %v861_v40  ;;  %2585 = vmatprep.subr.bf16.mxu1 %v2785_v29 }
 0x223   : > { %2574 = vmatmul.mubr.msk.bf16.gmra.mrb[12].mxu1 %vm1032_vm2, %v2342_v41  ;;  %v897_v33 = vpop.permute.xlu0 %896 }
 0x224   : > { %2586 = vmatpush3.bf16.msra.mxu1 %v2785_v29  ;;  %v3253_v42 = vsel %vm932_vm0, %v915_v35, %v897_v33 }
 0x225   : > { %v2353_v43 = vcombine.low %v3253_v42, %v936_v11  ;;  %2587 = vmatprep.subr.bf16.mxu1 %v2786_v19  ;;  %v2379_v55 = vcombine.low %v950_v39, %v3253_v42 }
 0x227   : > { %2589 = vmatprep.mubr.msk.bf16.mxu1 %vm1032_vm2, %v2353_v43 }
 0x228   : > { %2588 = vmatpush3.bf16.msra.mxu1 %v2786_v19 }
 0x229   : > { %2597 = vmatprep.subr.bf16.mxu1 %v2787_v44 }
 0x22b   : > { %2590 = vmatmul.mubr.msk.bf16.vlgmr.msra.gmra.mrb[8].mxu1 %vm1032_vm2, %v2354_v45 }
 0x22c   : > { %2598 = vmatpush3.bf16.msra.mxu1 %v2787_v44  ;;  %2593 = vmatprep.mubr.msk.bf16.mxu1 %vm1032_vm2, %v2355_v47 }
 0x22d   : > { %2599 = vmatprep.subr.bf16.mxu1 %v2788_v46 }
 0x230   : > { %2600 = vmatpush3.bf16.msra.mxu1 %v2788_v46 }
 0x231   : > { %2601 = vmatprep.subr.bf16.mxu1 %v2789_v48 }
 0x233   : > { %2594 = vmatmul.mubr.msk.bf16.gmra.mrb[12].mxu1 %vm1032_vm2, %v2356_v51 }
 0x234   : > { %2602 = vmatpush3.bf16.msra.mxu1 %v2789_v48  ;;  %2609 = vmatprep.mubr.msk.bf16.mxu1 %vm1032_vm2, %v2354_v45  ;;  %v2796_v48 = vld [vmem:[%s3675_s5 + $0x48] sm:$0xff]  }
 0x235   : > { %2603 = vmatprep.subr.bf16.mxu1 %v2790_v52  ;;  %2623 = vmatprep.subr.bf16.mxu0 %v2796_v48 }
 0x236   : > { %2624 = vmatpush3.bf16.msra.mxu0 %v2796_v48 }
 0x238   : > { %2604 = vmatpush3.bf16.msra.mxu1 %v2790_v52 }
 0x239   : > { %2605 = vmatprep.subr.bf16.mxu1 %v2791_v53 }
 0x23c   : > { %2606 = vmatpush3.bf16.msra.mxu1 %v2791_v53 }
 0x23d   : > { %2607 = vmatprep.subr.bf16.mxu1 %v2792_v54 }
 0x240   : > { %2608 = vmatpush3.bf16.msra.mxu1 %v2792_v54 }
 0x243   : > { %2610 = vmatmul.mubr.msk.bf16.vlgmr.msra.gmra.mrb[8].mxu1 %vm1032_vm2, %v2355_v47 }
 0x244   : > { %2613 = vmatprep.mubr.msk.bf16.mxu1 %vm1032_vm2, %v2356_v51 }
 0x24b   : > { %2614 = vmatmul.mubr.msk.bf16.gmra.mrb[12].mxu1 %vm1032_vm2, %v2379_v55 }
 0x316   : > { %v2611_v59 = vpop.f32.mrb[8].mxu1 }
 0x317   : > { %v1364_v60 = vadd.f32 %v2611_v59, %v2390_v58  ;;  %v1316_v61 = vpop.f32.mrb[9].mxu1 }
 0x318   : > { %v1362_v62 = vadd.f32 %v2390_v58, %v1316_v61  ;;  %v2612_v63 = vpop.f32.mrb[10].mxu1 }
 0x319   : > { %vm1372_vm3 = vcmp.gt.f32.partialorder %v1364_v60, 0.0  ;;  %v1380_v0 = vmul.f32 0.1, %v1364_v60  ;;  %v1365_v2 = vadd.f32 %v2612_v63, %v2390_v58  ;;  %v1319_v4 = vpop.f32.mrb[11].mxu1 }
 0x31a   : > { %vm1370_vm4 = vcmp.gt.f32.partialorder %v1362_v62, 0.0  ;;  %v1378_v6 = vmul.f32 0.1, %v1362_v62  ;;  %v1363_v7 = vadd.f32 %v2390_v58, %v1319_v4 }
 0x31b   : > { %v1388_v9 = vsel %vm1372_vm3, %v1364_v60, %v1380_v0  ;;  %vm1373_vm5 = vcmp.gt.f32.partialorder %v1365_v2, 0.0  ;;  %v1381_v10 = vmul.f32 0.1, %v1365_v2 }
 0x31c   : > { %v1396_v11 = vpack.c.bf16 %v1388_v9, %v1388_v9  ;;  %v1386_v13 = vsel %vm1370_vm4, %v1362_v62, %v1378_v6  ;;  %vm1371_vm6 = vcmp.gt.f32.partialorder %v1363_v7, 0.0  ;;  %v1379_v15 = vmul.f32 0.1, %v1363_v7 }
 0x31d   : > { %v1394_v16 = vpack.c.bf16 %v1386_v13, %v1386_v13  ;;  %v1389_v17 = vsel %vm1373_vm5, %v1365_v2, %v1381_v10  ;;  %vm2073_vm4 = vcmask 1043459   ;;  %vm2079_vm5 = vcmask 1045509  }
 0x31e   : > { %v1417_v18 = vshrl.u32 %v1396_v11, 16  ;;  %v1397_v38 = vpack.c.bf16 %v1389_v17, %v1389_v17  ;;  %v1387_v20 = vsel %vm1371_vm6, %v1363_v7, %v1379_v15  ;;  %v2615_v49 = vpop.f32.mrb[12].mxu1  ;;  %v1420_v8 = vshll.u32 %v1396_v11, 16  ;;  %v2797_v7 = vld [vmem:[%s3675_s5 + $0x50] sm:$0xff]  }
 0x31f   : > { %v1403_v5 = vshrl.u32 %v1394_v16, 16  ;;  %v1395_v50 = vpack.c.bf16 %v1387_v20, %v1387_v20  ;;  %v1368_v1 = vadd.f32 %v2615_v49, %v2390_v58  ;;  %v1332_v22 = vpop.f32.mrb[13].mxu1  ;;  %v1406_v14 = vshll.u32 %v1394_v16, 16  ;;  %2625 = vmatprep.subr.bf16.mxu0 %v2797_v7 }
 0x320   : > { %v1419_v12 = vrot.slane %v1417_v18, 7  ;;  %v1424_v24 = vshrl.u32 %v1397_v38, 16  ;;  %v1366_v25 = vadd.f32 %v2390_v58, %v1332_v22  ;;  %v2616_v21 = vpop.f32.mrb[14].mxu1  ;;  %v1427_v28 = vshll.u32 %v1397_v38, 16  ;;  %2626 = vmatpush3.bf16.msra.mxu0 %v2797_v7 }
 0x321   : > { %v1405_v26 = vrot.slane %v1403_v5, 7  ;;  %v1410_v30 = vshrl.u32 %v1395_v50, 16  ;;  %vm1376_vm7 = vcmp.gt.f32.partialorder %v1368_v1, 0.0  ;;  %v1335_v29 = vpop.f32.mrb[15].mxu1  ;;  %v1413_v32 = vshll.u32 %v1395_v50, 16  ;;  %2627 = vmatprep.subr.bf16.mxu0 %v2798_v3 }
 0x322   : > { %v1422_v31 = vor.u32 %v1420_v8, %v1419_v12  ;;  %v1384_v34 = vmul.f32 0.1, %v1368_v1  ;;  %vm1374_vm8 = vcmp.gt.f32.partialorder %v1366_v25, 0.0  ;;  %v1382_v39 = vmul.f32 0.1, %v1366_v25 }
 0x323   : > { %v1408_v36 = vor.u32 %v1406_v14, %v1405_v26  ;;  %v1412_v37 = vrot.slane %v1410_v30, 7  ;;  %v1369_v40 = vadd.f32 %v2616_v21, %v2390_v58  ;;  %v1426_v41 = vrot.slane %v1424_v24, 7  ;;  %v3341_v26 = vld [vmem:[%s3675_s5] sm:$0xff]  }
 0x324   : > { %v1392_v35 = vsel %vm1376_vm7, %v1368_v1, %v1384_v34  ;;  %v1367_v19 = vadd.f32 %v2390_v58, %v1335_v29  ;;  %v1468_v33 = vsel %vm3090_vm11, 0, %v1422_v31  ;;  %v1390_v45 = vsel %vm1374_vm8, %v1366_v25, %v1382_v39  ;;  %2628 = vmatpush3.bf16.msra.mxu0 %v2798_v3 }
 0x325   : > { %v1415_v43 = vor.u32 %v1413_v32, %v1412_v37  ;;  %v1400_v44 = vpack.c.bf16 %v1392_v35, %v1392_v35  ;;  %vm1377_vm9 = vcmp.gt.f32.partialorder %v1369_v40, 0.0  ;;  %v1385_v46 = vmul.f32 0.1, %v1369_v40  ;;  %2637 = vmatprep.subr.bf16.mxu0 %v3341_v26 }
 0x326   : > { %vm1375_vm10 = vcmp.gt.f32.partialorder %v1367_v19, 0.0  ;;  %v1383_v47 = vmul.f32 0.1, %v1367_v19  ;;  %v1398_v52 = vpack.c.bf16 %v1390_v45, %v1390_v45  ;;  %v1466_v53 = vsel %vm3090_vm11, 0, %v1408_v36 }
 0x327   : > { %v1445_v51 = vshrl.u32 %v1400_v44, 16  ;;  %v1467_v54 = vsel %vm3090_vm11, 0, %v1415_v43  ;;  %v1393_v55 = vsel %vm1377_vm9, %v1369_v40, %v1385_v46  ;;  %v1429_v57 = vor.u32 %v1427_v28, %v1426_v41 }
 0x328   : > { %v1391_v56 = vsel %vm1375_vm10, %v1367_v19, %v1383_v47  ;;  %v1401_v58 = vpack.c.bf16 %v1393_v55, %v1393_v55  ;;  %v3306_v59 = vsel %vm3096_vm12, %v1466_v53, 0  ;;  %v3311_v62 = vsel %vm3096_vm12, %v1467_v54, 0 }
 0x329   : > { %v1399_v60 = vpack.c.bf16 %v1391_v56, %v1391_v56  ;;  %v1562_v61 = vrot.slane %v3306_v59, 1  ;;  %v3315_v63 = vsel %vm3096_vm12, %v1468_v33, 0  ;;  %v1447_v0 = vrot.slane %v1445_v51, 7 }
 0x32a   : > { %v1431_v2 = vshrl.u32 %v1398_v52, 16  ;;  %v1452_v4 = vshrl.u32 %v1401_v58, 16  ;;  %v1563_v6 = vrot.slane %v3311_v62, 1  ;;  %v1448_v9 = vshll.u32 %v1400_v44, 16 }
 0x32b   : > { %1570 = vrot.lane.b32.xlu1 %v1562_v61, %s2876_s23  ;;  %v1499_v10 = vshll.u32 %v3315_v63, 16  ;;  %v1469_v11 = vsel %vm3090_vm11, 0, %v1429_v57  ;;  %v1438_v15 = vshrl.u32 %v1399_v60, 16  ;;  %v1485_v17 = vshll.u32 %v3306_v59, 16 }
 0x32c   : > { %v1454_v13 = vrot.slane %v1452_v4, 7  ;;  %1572 = vrot.lane.b32.xlu0 %v1563_v6, %s2876_s23  ;;  %v3328_v16 = vsel %vm3096_vm12, %v1469_v11, 0  ;;  %v1450_v18 = vor.u32 %v1448_v9, %v1447_v0  ;;  %v1433_v38 = vrot.slane %v1431_v2, 7 }
 0x32d   : > { %v1497_v20 = vshrl.u32 %v3315_v63, 16  ;;  %v1501_v49 = vrot.slane %v1499_v10, 1  ;;  %v1455_v8 = vshll.u32 %v1401_v58, 16  ;;  %v1506_v5 = vshll.u32 %v3328_v16, 16 }
 0x32e   : > { %v1492_v50 = vshll.u32 %v3311_v62, 16  ;;  %v1434_v1 = vshll.u32 %v1398_v52, 16  ;;  %v1487_v12 = vrot.slane %v1485_v17, 1  ;;  %v1440_v24 = vrot.slane %v1438_v15, 7 }
 0x32f   : > { %v1502_v22 = vor.u32 %v1501_v49, %v1497_v20  ;;  %v1457_v14 = vor.u32 %v1455_v8, %v1454_v13  ;;  %v1504_v25 = vshrl.u32 %v3328_v16, 16  ;;  %v1508_v21 = vrot.slane %v1506_v5, 1 }
 0x330   : > { %v1436_v28 = vor.u32 %v1434_v1, %v1433_v38  ;;  %v1483_v30 = vshrl.u32 %v3306_v59, 16  ;;  %v1472_v29 = vsel %vm3090_vm11, 0, %v1450_v18  ;;  %v1441_v31 = vshll.u32 %v1399_v60, 16 }
 0x331   : > { %1542 = vrot.lane.b32.xlu1 %v1502_v22, %s2877_s16  ;;  %v1509_v32 = vor.u32 %v1508_v21, %v1504_v25  ;;  %v1494_v34 = vrot.slane %v1492_v50, 1  ;;  %v1490_v39 = vshrl.u32 %v3311_v62, 16  ;;  %v3352_v40 = vsel %vm3096_vm12, %v1472_v29, 0  ;;  %v2800_v25 = vld [vmem:[%s3675_s5 + $0x8] sm:$0xff]   ;;  %v2802_v29 = vld [vmem:[%s3675_s5 + $0x18] sm:$0xff]  }
 0x332   : > { %v1488_v36 = vor.u32 %v1487_v12, %v1483_v30  ;;  %v1443_v37 = vor.u32 %v1441_v31, %v1440_v24  ;;  %v1473_v41 = vsel %vm3090_vm11, 0, %v1457_v14  ;;  %v1470_v35 = vsel %vm3090_vm11, 0, %v1436_v28 }
 0x333   : > { %1544 = vrot.lane.b32.xlu0 %v1509_v32, %s2877_s16  ;;  %v1495_v19 = vor.u32 %v1494_v34, %v1490_v39  ;;  %v1564_v33 = vrot.slane %v3315_v63, 1  ;;  %v1527_v43 = vshll.u32 %v3352_v40, 16  ;;  %v3363_v44 = vsel %vm3096_vm12, %v1473_v41, 0  ;;  %v2803_v39 = vld [vmem:[%s3675_s5 + $0x20] sm:$0xff]  }
 0x334   : > { %v3368_v45 = vsel %vm3096_vm12, %v1470_v35, 0  ;;  %v1471_v46 = vsel %vm3090_vm11, 0, %v1443_v37  ;;  %v1565_v47 = vrot.slane %v3328_v16, 1  ;;  %v1534_v48 = vshll.u32 %v3363_v44, 16 }
 0x335   : > { %1538 = vrot.lane.b32.xlu1 %v1488_v36, %s2877_s16  ;;  %v1566_v51 = vrot.slane %v3368_v45, 1  ;;  %v3378_v52 = vsel %vm3096_vm12, %v1471_v46, 0  ;;  %v1529_v53 = vrot.slane %v1527_v43, 1  ;;  %v1513_v54 = vshll.u32 %v3368_v45, 16 }
 0x336   : > { %v1525_v23 = vshrl.u32 %v3352_v40, 16  ;;  %v1567_v55 = vrot.slane %v3378_v52, 1  ;;  %v1536_v56 = vrot.slane %v1534_v48, 1  ;;  %v1520_v57 = vshll.u32 %v3378_v52, 16 }
 0x337   : > { %1540 = vrot.lane.b32.xlu0 %v1495_v19, %s2877_s16  ;;  %v1515_v60 = vrot.slane %v1513_v54, 1  ;;  %v1532_v27 = vshrl.u32 %v3363_v44, 16  ;;  %v1511_v61 = vshrl.u32 %v3368_v45, 16  ;;  %v1518_v6 = vshrl.u32 %v3378_v52, 16 }
 0x338   : > { %v1530_v58 = vor.u32 %v1529_v53, %v1525_v23  ;;  %v1522_v2 = vrot.slane %v1520_v57, 1  ;;  %v1568_v9 = vrot.slane %v3352_v40, 1  ;;  %v1569_v10 = vrot.slane %v3363_v44, 1  ;;  %v2807_v53 = vld [vmem:[%s3675_s5 + $0x70] sm:$0xff]   ;;  %v2808_v23 = vld [vmem:[%s3675_s5 + $0x78] sm:$0xff]  }
 0x339   : > { %1574 = vrot.lane.b32.xlu1 %v1564_v33, %s2876_s23  ;;  %v1537_v0 = vor.u32 %v1536_v56, %v1532_v27  ;;  %v1516_v4 = vor.u32 %v1515_v60, %v1511_v61  ;;  %v2810_v56 = vld [vmem:[%s3675_s5 + $0x88] sm:$0xff]   ;;  %vm2076_vm6 = vcmask 1044484   ;;  %vm2082_vm7 = vcmask 1046534  }
 0x33a   : > { %v1523_v7 = vor.u32 %v1522_v2, %v1518_v6  ;;  %vm2085_vm8 = vcmask 1047559  }
 0x33b   : > { %1576 = vrot.lane.b32.xlu0 %v1565_v47, %s2876_s23  ;;  %v2804_v47 = vld [vmem:[%s3675_s5 + $0x28] sm:$0xff]  }
 0x33d   : > { %1578 = vrot.lane.b32.xlu1 %v1566_v51, %s2876_s23  ;;  %v2806_v51 = vld [vmem:[%s3675_s5 + $0x68] sm:$0xff]  }
 0x33f   : > { %1580 = vrot.lane.b32.xlu0 %v1567_v55, %s2876_s23  ;;  %v2809_v55 = vld [vmem:[%s3675_s5 + $0x80] sm:$0xff]  }
 0x341   : > { %1550 = vrot.lane.b32.xlu1 %v1530_v58, %s2877_s16  ;;  %v2454_v58 = vld [vmem:[%s3676_s6] ss:$0 sm:$0xff] }
 0x343   : > { %1552 = vrot.lane.b32.xlu0 %v1537_v0, %s2877_s16 }
 0x345   : > { %1546 = vrot.lane.b32.xlu1 %v1516_v4, %s2877_s16 }
 0x347   : > { %1548 = vrot.lane.b32.xlu0 %v1523_v7, %s2877_s16 }
 0x349   : > { %1582 = vrot.lane.b32.xlu1 %v1568_v9, %s2876_s23 }
 0x34b   : > { %1584 = vrot.lane.b32.xlu0 %v1569_v10, %s2876_s23 }
 0x39d   : > { %v1571_v11 = vpop.permute.xlu1 %1570 }
 0x39e   : > { %v1573_v13 = vpop.permute.xlu0 %1572 }
 0x3a3   : > { %v1543_v15 = vpop.permute.xlu1 %1542 }
 0x3a4   : > { %v1591_v1 = vsel %vm491_vm1, %v3315_v63, %v1543_v15 }
 0x3a5   : > { %v1545_v17 = vpop.permute.xlu0 %1544 }
 0x3a6   : > { %v1593_v22 = vsel %vm491_vm1, %v3328_v16, %v1545_v17  ;;  %v2801_v16 = vld [vmem:[%s3675_s5 + $0x10] sm:$0xff]  }
 0x3a7   : > { %v1539_v18 = vpop.permute.xlu1 %1538 }
 0x3a8   : > { %v1587_v38 = vsel %vm491_vm1, %v3306_v59, %v1539_v18 }
 0x3a9   : > { %v1541_v20 = vpop.permute.xlu0 %1540  ;;  %v1603_v8 = vsel %vm932_vm0, %v1587_v38, %v1571_v11 }
 0x3aa   : > { %v1589_v49 = vsel %vm491_vm1, %v3311_v62, %v1541_v20  ;;  %v2417_v48 = vcombine.low %v3253_v42, %v1603_v8 }
 0x3ab   : > { %v1575_v3 = vpop.permute.xlu1 %1574  ;;  %v1605_v5 = vsel %vm932_vm0, %v1589_v49, %v1573_v13 }
 0x3ac   : > { %v2403_v50 = vcombine.low %v1603_v8, %v1605_v5  ;;  %v1607_v14 = vsel %vm932_vm0, %v1591_v1, %v1575_v3 }
 0x3ad   : > { %v1577_v12 = vpop.permute.xlu0 %1576 }
 0x3ae   : > { %v1609_v59 = vsel %vm932_vm0, %v1593_v22, %v1577_v12  ;;  %2629 = vmatprep.mubr.msk.bf16.mxu0 %vm1032_vm2, %v2403_v50 }
 0x3af   : > { %v1579_v62 = vpop.permute.xlu1 %1578  ;;  %v2404_v24 = vcombine.low %v1607_v14, %v1609_v59 }
 0x3b1   : > { %2630 = vmatmul.mubr.msk.bf16.vlgmr.msra.gmra.mrb[8].mxu0 %vm1032_vm2, %v2404_v24  ;;  %v1581_v21 = vpop.permute.xlu0 %1580 }
 0x3b2   : > { %2638 = vmatpush3.bf16.msra.mxu0 %v3341_v26 }
 0x3b3   : > { %v1551_v63 = vpop.permute.xlu1 %1550  ;;  %2639 = vmatprep.subr.bf16.mxu0 %v2800_v25 }
 0x3b4   : > { %v1599_v35 = vsel %vm491_vm1, %v3352_v40, %v1551_v63  ;;  %v2805_v40 = vld [vmem:[%s3675_s5 + $0x60] sm:$0xff]  }
 0x3b5   : > { %v1553_v28 = vpop.permute.xlu0 %1552 }
 0x3b6   : > { %2640 = vmatpush3.bf16.msra.mxu0 %v2800_v25  ;;  %v1601_v19 = vsel %vm491_vm1, %v3363_v44, %v1553_v28  ;;  %v2418_v44 = vcombine.low %v1605_v5, %v1607_v14 }
 0x3b7   : > { %v1547_v30 = vpop.permute.xlu1 %1546  ;;  %2641 = vmatprep.subr.bf16.mxu0 %v2801_v16 }
 0x3b8   : > { %v1595_v31 = vsel %vm491_vm1, %v3368_v45, %v1547_v30 }
 0x3b9   : > { %v1549_v32 = vpop.permute.xlu0 %1548  ;;  %v1611_v34 = vsel %vm932_vm0, %v1595_v31, %v1579_v62 }
 0x3ba   : > { %2642 = vmatpush3.bf16.msra.mxu0 %v2801_v16  ;;  %v1597_v26 = vsel %vm491_vm1, %v3378_v52, %v1549_v32  ;;  %v2419_v52 = vcombine.low %v1609_v59, %v1611_v34 }
 0x3bb   : > { %v1583_v36 = vpop.permute.xlu1 %1582  ;;  %v1613_v37 = vsel %vm932_vm0, %v1597_v26, %v1581_v21  ;;  %2643 = vmatprep.subr.bf16.mxu0 %v2802_v29 }
 0x3bc   : > { %v2405_v41 = vcombine.low %v1611_v34, %v1613_v37  ;;  %v1615_v43 = vsel %vm932_vm0, %v1599_v35, %v1583_v36 }
 0x3bd   : > { %v1585_v33 = vpop.permute.xlu0 %1584  ;;  %v2420_v54 = vcombine.low %v1613_v37, %v1615_v43 }
 0x3be   : > { %2644 = vmatpush3.bf16.msra.mxu0 %v2802_v29  ;;  %v1617_v45 = vsel %vm932_vm0, %v1601_v19, %v1585_v33  ;;  %2633 = vmatprep.mubr.msk.bf16.mxu0 %vm1032_vm2, %v2405_v41 }
 0x3bf   : > { %v2406_v46 = vcombine.low %v1615_v43, %v1617_v45  ;;  %2645 = vmatprep.subr.bf16.mxu0 %v2803_v39  ;;  %v2443_v57 = vcombine.low %v1617_v45, %v3253_v42 }
 0x3c1   : > { %2634 = vmatmul.mubr.msk.bf16.gmra.mrb[12].mxu0 %vm1032_vm2, %v2406_v46 }
 0x3c2   : > { %2646 = vmatpush3.bf16.msra.mxu0 %v2803_v39  ;;  %2649 = vmatprep.mubr.msk.bf16.mxu0 %vm1032_vm2, %v2417_v48 }
 0x3c3   : > { %2647 = vmatprep.subr.bf16.mxu0 %v2804_v47 }
 0x3c6   : > { %2648 = vmatpush3.bf16.msra.mxu0 %v2804_v47 }
 0x3c7   : > { %2657 = vmatprep.subr.bf16.mxu0 %v2805_v40 }
 0x3c9   : > { %2650 = vmatmul.mubr.msk.bf16.vlgmr.msra.gmra.mrb[8].mxu0 %vm1032_vm2, %v2418_v44 }
 0x3ca   : > { %2658 = vmatpush3.bf16.msra.mxu0 %v2805_v40  ;;  %2653 = vmatprep.mubr.msk.bf16.mxu0 %vm1032_vm2, %v2419_v52 }
 0x3cb   : > { %2659 = vmatprep.subr.bf16.mxu0 %v2806_v51 }
 0x3ce   : > { %2660 = vmatpush3.bf16.msra.mxu0 %v2806_v51 }
 0x3cf   : > { %2661 = vmatprep.subr.bf16.mxu0 %v2807_v53 }
 0x3d1   : > { %2654 = vmatmul.mubr.msk.bf16.gmra.mrb[12].mxu0 %vm1032_vm2, %v2420_v54 }
 0x3d2   : > { %2662 = vmatpush3.bf16.msra.mxu0 %v2807_v53  ;;  %2669 = vmatprep.mubr.msk.bf16.mxu0 %vm1032_vm2, %v2418_v44 }
 0x3d3   : > { %2663 = vmatprep.subr.bf16.mxu0 %v2808_v23 }
 0x3d6   : > { %2664 = vmatpush3.bf16.msra.mxu0 %v2808_v23 }
 0x3d7   : > { %2665 = vmatprep.subr.bf16.mxu0 %v2809_v55 }
 0x3da   : > { %2666 = vmatpush3.bf16.msra.mxu0 %v2809_v55 }
 0x3db   : > { %2667 = vmatprep.subr.bf16.mxu0 %v2810_v56 }
 0x3de   : > { %2668 = vmatpush3.bf16.msra.mxu0 %v2810_v56 }
 0x3e1   : > { %2670 = vmatmul.mubr.msk.bf16.vlgmr.msra.gmra.mrb[8].mxu0 %vm1032_vm2, %v2419_v52 }
 0x3e2   : > { %2673 = vmatprep.mubr.msk.bf16.mxu0 %vm1032_vm2, %v2420_v54 }
 0x3e9   : > { %2674 = vmatmul.mubr.msk.bf16.gmra.mrb[12].mxu0 %vm1032_vm2, %v2443_v57 }
 0x4b4   : > { %v2671_v60 = vpop.f32.mrb[8].mxu0 }
 0x4b5   : > { %v2028_v27 = vadd.f32 %v2671_v60, %v2454_v58  ;;  %v1980_v61 = vpop.f32.mrb[9].mxu0 }
 0x4b6   : > { %v2026_v0 = vadd.f32 %v2454_v58, %v1980_v61  ;;  %v2672_v2 = vpop.f32.mrb[10].mxu0 }
 0x4b7   : > { %vm2036_vm11 = vcmp.gt.f32.partialorder %v2028_v27, 0.0  ;;  %v2044_v4 = vmul.f32 0.1, %v2028_v27  ;;  %v2029_v6 = vadd.f32 %v2672_v2, %v2454_v58  ;;  %v1983_v7 = vpop.f32.mrb[11].mxu0 }
 0x4b8   : > { %vm2034_vm12 = vcmp.gt.f32.partialorder %v2026_v0, 0.0  ;;  %v2042_v9 = vmul.f32 0.1, %v2026_v0  ;;  %v2027_v10 = vadd.f32 %v2454_v58, %v1983_v7 }
 0x4b9   : > { %v3473_v42 = vsel %vm2036_vm11, %v2028_v27, %v2044_v4  ;;  %vm2037_vm14 = vcmp.gt.f32.partialorder %v2029_v6, 0.0  ;;  %v2045_v11 = vmul.f32 0.1, %v2029_v6 }
 0x4ba   : > { %v3475_v13 = vsel %vm2034_vm12, %v2026_v0, %v2042_v9  ;;  %vm2035_vm3 = vcmp.gt.f32.partialorder %v2027_v10, 0.0  ;;  %v2043_v15 = vmul.f32 0.1, %v2027_v10  ;;  %v2157_v38 = vrot.slane %v3473_v42, 3 }
 0x4bb   : > { %v2139_v17 = vrot.slane %v3475_v13, 4  ;;  %v3478_v18 = vsel %vm2037_vm14, %v2029_v6, %v2045_v11  ;;  %v2088_v20 = vrot.slane %v3475_v13, 1  ;;  %v2154_v8 = vrot.slane %v3475_v13, 5 }
 0x4bc   : > { %v3482_v49 = vsel %vm2035_vm3, %v2027_v10, %v2043_v15  ;;  %v2675_v3 = vpop.f32.mrb[12].mxu0  ;;  %v2159_v5 = vrot.slane %v3478_v18, 2  ;;  %v2090_v50 = vrot.slane %v3473_v42, 7  ;;  %v2092_v59 = vrot.slane %v3478_v18, 6 }
 0x4bd   : > { %v2066_v1 = vrot.slane %v3482_v49, 7  ;;  %v2032_v22 = vadd.f32 %v2675_v3, %v2454_v58  ;;  %v1996_v12 = vpop.f32.mrb[13].mxu0  ;;  %v2155_v14 = vrot.slane %v3482_v49, 4  ;;  %v2089_v25 = vsel %vm2067_vm13, %v3482_v49, %v2088_v20 }
 0x4be   : > { %v2030_v62 = vadd.f32 %v2454_v58, %v1996_v12  ;;  %v2676_v24 = vpop.f32.mrb[14].mxu0  ;;  %v2171_v21 = vrot.slane %v3475_v13, 6  ;;  %v2172_v63 = vrot.slane %v3482_v49, 5  ;;  %v2091_v43 = vsel %vm2070_vm15, %v2090_v50, %v2089_v25 }
 0x4bf   : > { %vm2040_vm9 = vcmp.gt.f32.partialorder %v2032_v22, 0.0  ;;  %v2048_v16 = vmul.f32 0.1, %v2032_v22  ;;  %v2033_v28 = vadd.f32 %v2676_v24, %v2454_v58  ;;  %v1999_v30 = vpop.f32.mrb[15].mxu0  ;;  %v2156_v29 = vsel %vm2067_vm13, %v2155_v14, %v2154_v8 }
 0x4c0   : > { %vm2038_vm10 = vcmp.gt.f32.partialorder %v2030_v62, 0.0  ;;  %v2046_v31 = vmul.f32 0.1, %v2030_v62  ;;  %v2031_v32 = vadd.f32 %v2454_v58, %v1999_v30  ;;  %v2158_v26 = vsel %vm2070_vm15, %v2157_v38, %v2156_v29 }
 0x4c1   : > { %v3496_v34 = vsel %vm2040_vm9, %v2032_v22, %v2048_v16  ;;  %vm2041_vm11 = vcmp.gt.f32.partialorder %v2033_v28, 0.0  ;;  %v2049_v36 = vmul.f32 0.1, %v2033_v28  ;;  %v2160_v37 = vsel %vm2073_vm4, %v2159_v5, %v2158_v26 }
 0x4c2   : > { %v3499_v39 = vsel %vm2038_vm10, %v2030_v62, %v2046_v31  ;;  %vm2039_vm12 = vcmp.gt.f32.partialorder %v2031_v32, 0.0  ;;  %v2047_v41 = vmul.f32 0.1, %v2031_v32  ;;  %v2164_v35 = vrot.slane %v3496_v34, 7 }
 0x4c3   : > { %v3502_v19 = vsel %vm2041_vm11, %v2033_v28, %v2049_v36  ;;  %v2161_v33 = vrot.slane %v3499_v39, 1  ;;  %v2094_v45 = vrot.slane %v3499_v39, 5  ;;  %v2093_v48 = vsel %vm2073_vm4, %v2092_v59, %v2091_v43 }
 0x4c4   : > { %v3507_v46 = vsel %vm2039_vm12, %v2031_v32, %v2047_v41  ;;  %v2166_v47 = vrot.slane %v3502_v19, 6  ;;  %v2098_v40 = vrot.slane %v3496_v34, 3  ;;  %v2100_v53 = vrot.slane %v3502_v19, 2 }
 0x4c5   : > { %v2162_v44 = vsel %vm2076_vm6, %v2161_v33, %v2160_v37  ;;  %v2095_v51 = vsel %vm2076_vm6, %v2094_v45, %v2093_v48  ;;  %v2096_v52 = vrot.slane %v3507_v46, 4  ;;  %v2173_v23 = vsel %vm2067_vm13, %v2172_v63, %v2171_v21 }
 0x4c6   : > { %v2163_v54 = vsel %vm2079_vm5, %v3507_v46, %v2162_v44  ;;  %v2174_v55 = vrot.slane %v3473_v42, 4  ;;  %v2176_v56 = vrot.slane %v3478_v18, 3  ;;  %v2178_v60 = vrot.slane %v3499_v39, 2 }
 0x4c7   : > { %v2165_v57 = vsel %vm2082_vm7, %v2164_v35, %v2163_v54  ;;  %v2097_v58 = vsel %vm2079_vm5, %v2096_v52, %v2095_v51  ;;  %v2180_v27 = vrot.slane %v3507_v46, 1  ;;  %v2140_v61 = vrot.slane %v3482_v49, 3 }
 0x4c8   : > { %v2167_v0 = vsel %vm2085_vm8, %v2166_v47, %v2165_v57  ;;  %v2099_v2 = vsel %vm2082_vm7, %v2098_v40, %v2097_v58  ;;  %v2175_v4 = vsel %vm2070_vm15, %v2174_v55, %v2173_v23  ;;  %v2105_v9 = vrot.slane %v3475_v13, 2 }
 0x4c9   : > { %2168 = vrot.lane.b32.xlu0 %v2167_v0, %s2877_s16  ;;  %v2101_v6 = vsel %vm2085_vm8, %v2100_v53, %v2099_v2  ;;  %v2177_v7 = vsel %vm2073_vm4, %v2176_v56, %v2175_v4  ;;  %v2106_v10 = vrot.slane %v3482_v49, 1  ;;  %v2183_v15 = vrot.slane %v3502_v19, 7 }
 0x4ca   : > { %2102 = vrot.lane.b32.xlu1 %v2101_v6, %s2877_s16  ;;  %v2179_v11 = vsel %vm2076_vm6, %v2178_v60, %v2177_v7  ;;  %v2109_v38 = vrot.slane %v3478_v18, 7  ;;  %v2111_v20 = vrot.slane %v3499_v39, 6  ;;  %v2113_v5 = vrot.slane %v3507_v46, 5  ;;  %s269_s16 = sand.u32 1, %s2865_s25  }
 0x4cb   : > { %v2181_v3 = vsel %vm2079_vm5, %v2180_v27, %v2179_v11  ;;  %v2107_v8 = vsel %vm2067_vm13, %v2106_v10, %v2105_v9  ;;  %v2115_v50 = vrot.slane %v3496_v34, 4  ;;  %v2188_v14 = vrot.slane %v3475_v13, 7  ;;  %s2291_s19 = sshll.u32 %s269_s16, 4  ;;  %s2214_s28 = scalar_lea.sflag [#allocation3], %s269_s16 }
 0x4cc   : > { %v2182_v22 = vsel %vm2082_vm7, %v3496_v34, %v2181_v3  ;;  %v2108_v12 = vsel %vm2070_vm15, %v3473_v42, %v2107_v8  ;;  %v2189_v59 = vrot.slane %v3482_v49, 6  ;;  %v2191_v25 = vrot.slane %v3473_v42, 5  ;;  %s271_s21 = scalar_lea.vmem [#allocation2], %s2291_s19 }
 0x4cd   : > { %v2184_v62 = vsel %vm2085_vm8, %v2183_v15, %v2182_v22  ;;  %v2110_v24 = vsel %vm2073_vm4, %v2109_v38, %v2108_v12  ;;  %v2193_v21 = vrot.slane %v3478_v18, 4  ;;  %v2195_v28 = vrot.slane %v3499_v39, 3  ;;  %s2228_s22 = sshll.u32 %s271_s21, 4  ;;  %s3629_s22 = int_to_ptr.vmem [resolvable:$true] %s2228_s22 }
 0x4ce   : > { %2185 = vrot.lane.b32.xlu0 %v2184_v62, %s2876_s23  ;;  %v2112_v63 = vsel %vm2076_vm6, %v2111_v20, %v2110_v24  ;;  %v2190_v16 = vsel %vm2067_vm13, %v2189_v59, %v2188_v14  ;;  %v2197_v30 = vrot.slane %v3507_v46, 2  ;;  %v2117_v31 = vrot.slane %v3502_v19, 3  ;;  %s2811_s13 = scalar_lea.vmem %s3629_s22, 256  ;;  %p2818_p0 = scmp.lt.s32.totalorder %s3629_s22, %s2816_s15 }
 0x4cf   : > { %v2114_v29 = vsel %vm2079_vm5, %v2113_v5, %v2112_v63  ;;  %v2192_v32 = vsel %vm2070_vm15, %v2191_v25, %v2190_v16  ;;  %v2199_v26 = vrot.slane %v3496_v34, 1  ;;  %v2122_v41 = vrot.slane %v3475_v13, 3  ;;  %p2812_p11 = scmp.ne.s32.totalorder %s3629_s22, %s2811_s13  ;;  %p2819_p1 = scmp.lt.s32.totalorder %s2817_s17, %s2811_s13 }
 0x4d0   : > { %v2116_v36 = vsel %vm2082_vm7, %v2115_v50, %v2114_v29  ;;  %v2194_v37 = vsel %vm2073_vm4, %v2193_v21, %v2192_v32  ;;  %v2123_v35 = vrot.slane %v3482_v49, 2  ;;  %v2125_v45 = vrot.slane %v3473_v42, 1 }
 0x4d1   : > { %v2118_v33 = vsel %vm2085_vm8, %v2117_v31, %v2116_v36  ;;  %v2196_v43 = vsel %vm2076_vm6, %v2195_v28, %v2194_v37  ;;  %v2128_v47 = vrot.slane %v3499_v39, 7  ;;  %v2130_v44 = vrot.slane %v3507_v46, 6  ;;  %p2813_p12 = pnand %p2812_p11, %p2959_p5  ;;  %p2820_p2 = por %p2819_p1, %p2818_p0 }
 0x4d2   : > { %2119 = vrot.lane.b32.xlu1 %v2118_v33, %s2876_s23  ;;  %v2198_v48 = vsel %vm2079_vm5, %v2197_v30, %v2196_v43  ;;  %v2124_v40 = vsel %vm2067_vm13, %v2123_v35, %v2122_v41  ;;  %v2132_v51 = vrot.slane %v3496_v34, 5  ;;  %v2141_v54 = vsel %vm2067_vm13, %v2140_v61, %v2139_v17  ;;  %s2879_s23 = smov 96  }
 0x4d3   : > { %v2200_v52 = vsel %vm2082_vm7, %v2199_v26, %v2198_v48  ;;  %v2126_v53 = vsel %vm2070_vm15, %v2125_v45, %v2124_v40  ;;  %v2142_v23 = vrot.slane %v3473_v42, 2  ;;  %v2134_v57 = vrot.slane %v3502_v19, 4  ;;  %p2814_p13 = pneg %p2813_p12 }
 0x4d4   : > { %v2201_v55 = vsel %vm2085_vm8, %v3502_v19, %v2200_v52  ;;  %v2127_v56 = vsel %vm2073_vm4, %v3478_v18, %v2126_v53  ;;  %v2144_v58 = vrot.slane %v3478_v18, 1  ;;  %v2149_v17 = vrot.slane %v3496_v34, 6 }
 0x4d5   : > { %2202 = vrot.lane.b32.xlu0 %v2201_v55, %s2879_s23  ;;  %v2129_v60 = vsel %vm2076_vm6, %v2128_v47, %v2127_v56  ;;  %v2143_v27 = vsel %vm2070_vm15, %v2142_v23, %v2141_v54  ;;  %v2147_v61 = vrot.slane %v3507_v46, 7  ;;  %v2068_v4 = vsel %vm2067_vm13, %v2066_v1, %v3475_v13  ;;  %p2821_p3 = pnand %p2820_p2, %p2814_p13 }
 0x4d6   : > { %v2131_v0 = vsel %vm2079_vm5, %v2130_v44, %v2129_v60  ;;  %v2145_v2 = vsel %vm2073_vm4, %v2144_v58, %v2143_v27  ;;  %v2069_v6 = vrot.slane %v3473_v42, 6  ;;  %v2072_v10 = vrot.slane %v3478_v18, 5 }
 0x4d7   : > { %v2133_v7 = vsel %vm2082_vm7, %v2132_v51, %v2131_v0  ;;  %v2146_v9 = vsel %vm2076_vm6, %v3499_v39, %v2145_v2  ;;  %v2075_v11 = vrot.slane %v3499_v39, 4  ;;  %v2151_v38 = vrot.slane %v3502_v19, 5 }
 0x4d8   : > { %v2135_v15 = vsel %vm2085_vm8, %v2134_v57, %v2133_v7  ;;  %v2148_v49 = vsel %vm2079_vm5, %v2147_v61, %v2146_v9  ;;  %v2071_v13 = vsel %vm2070_vm15, %v2069_v6, %v2068_v4  ;;  %v2078_v20 = vrot.slane %v3507_v46, 3 }
 0x4d9   : > { %2136 = vrot.lane.b32.xlu1 %v2135_v15, %s2879_s23  ;;  %v2150_v42 = vsel %vm2082_vm7, %v2149_v17, %v2148_v49  ;;  %v2074_v1 = vsel %vm2073_vm4, %v2072_v10, %v2071_v13  ;;  %v2081_v3 = vrot.slane %v3496_v34, 2  ;;  %v2084_v8 = vrot.slane %v3502_v19, 1 }
 0x4da   : > { %v2152_v18 = vsel %vm2085_vm8, %v2151_v38, %v2150_v42  ;;  %v2077_v39 = vsel %vm2076_vm6, %v2075_v11, %v2074_v1 }
 0x4db   : > { %v2080_v5 = vsel %vm2079_vm5, %v2078_v20, %v2077_v39 }
 0x4dc   : > { %v2083_v50 = vsel %vm2082_vm7, %v2081_v3, %v2080_v5 }
 0x4dd   : > { %v2086_v22 = vsel %vm2085_vm8, %v2084_v8, %v2083_v50 }
 0x53b   : > { %v2169_v12 = vpop.permute.xlu0 %2168 }
 0x53c   : > { %v2103_v14 = vpop.permute.xlu1 %2102  ;;  %v2208_v62 = vsel %vm491_vm1, %v2152_v18, %v2169_v12 }
 0x53d   : > { %v2205_v19 = vsel %vm491_vm1, %v2086_v22, %v2103_v14 }
 0x540   : > { %v2186_v59 = vpop.permute.xlu0 %2185 }
 0x541   : > { %v2209_v24 = vsel %vm932_vm0, %v2208_v62, %v2186_v59 }
 0x544   : > { %v2120_v46 = vpop.permute.xlu1 %2119 }
 0x545   : > { %v2206_v21 = vsel %vm932_vm0, %v2205_v19, %v2120_v46 }
 0x547   : > { %v2203_v25 = vpop.permute.xlu0 %2202 }
 0x548   : > { %v2210_v34 = vsel %vm1032_vm2, %v2209_v24, %v2203_v25 }
 0x549   : > { %2212 = vst [vmem:[%s271_s21 + $0x8] sm:$0xff] %v2210_v34 }
 0x54b   : > { %v2137_v63 = vpop.permute.xlu1 %2136 }
 0x54c   : > { %v2207_v16 = vsel %vm1032_vm2, %v2206_v21, %v2137_v63 }
 0x54d   : > { %2211 = vst [vmem:[%s271_s21] sm:$0xff] %v2207_v16 }
 0x54e   : > { %2824 = shalt.err (!%p2821_p3)
}
 0x54f   : > { %s2825_s18 = scalar_lea.hbm %s3627_s9, 256  ;;  %s2829_s19 = scalar_lea.hbm %s3677_s7, 512 }
 0x550   : > { %p2826_p4 = scmp.ne.s32.totalorder %s3627_s9, %s2825_s18  ;;  %p2830_p9 = scmp.lt.u32.totalorder %s3627_s9, %s3677_s7 }
 0x551   : > { %p2831_p10 = scmp.lt.u32.totalorder %s2829_s19, %s2825_s18  ;;  %p2833_p12 = scmp.lt.u32.totalorder %s2825_s18, %s3627_s9 }
 0x552   : > { %p2827_p7 = pnand %p2826_p4, %p2959_p5 }
 0x553   : > { %p2832_p11 = por %p2831_p10, %p2830_p9 }
 0x554   : > { %p2828_p8 = pneg %p2827_p7 }
 0x555   : > { %p2834_p13 = por %p2833_p12, %p2832_p11 }
 0x557   : > { %p2835_p0 = pnand %p2834_p13, %p2828_p8 }
 0x559   : > { %2838 = shalt.err (!%p2835_p0)
}
 0x55a   : > { %2718 = dma.vmem_to_hbm [thread:$0]  (%p2959_p5), %s3629_s22, 256, %s3627_s9, %s2214_s28  }
 0x55b PF: > { %p2724_p1 = scmp.ge.s32.totalorder %s2873_s27, 2  ;;  %s2240_s29 = sand.u32 1, %s2861_s24  }
 0x55c   : > { %s2241_s8 = scalar_lea.sflag [#allocation3], %s2240_s29 }
 0x55d   : > { %p2721_p2 = pnand %p2724_p1, %p2963_p6 }
 0x55f   : > { %2856 = dma.done.wait (!%p2721_p2), %s2241_s8, 256  }
 0x560   : > { %2858 = vsyncadd (!%p2721_p2), %s2241_s8, 4294967040  ;;  %p17_p3 = scmp.ge.s32.totalorder %s2946_s30, 4   ;;  %s3684_s24 = smov %s2865_s25 }
 0x561   : > { %s3685_s25 = smov %s2869_s26  ;;  %s3686_s26 = smov %s2957_s10 }
 0x562   : > { %s3687_s27 = smov %s2946_s30  ;;  %19 = sbr.rel (!%p17_p3) target bundleno = 3 (0x3), region = 88 }
 0x569   :  { %2246 = vsyncpa [#allocation3], 1 }
 0x56a   :  { %2248 = vsyncpa [#allocation3 + $0x1], 1 }

</bundles_post_ra>
